<compile_context>
chip_gen: v7x
topology: tpu7x:2x2x1
jax: 0.10.0
libtpu: 0.0.40
codegen_flags: <defaults>
</compile_context>

<pallas_src>
import jax
import jax.numpy as jnp
from jax.experimental import pallas as pl
from jax.experimental.pallas import tpu as pltpu

NEG_INF = jnp.float32(-1e30)


def _round_up(x, m):
    return ((x + m - 1) // m) * m


# ----------------------------------------------------------------------------
# Kernel A: attention (Bahdanau + coverage) + GRU cell.  Gridless, all-VMEM.
# ----------------------------------------------------------------------------
def attn_gru_kernel(emb_ref, enc_ref, encp_ref, hprev_ref, cov_ref, bias_ref,
                    ws_ref, wc_ref, battn_ref, v_ref,
                    wxh_ref, wch_ref, whh_ref, bi_ref, bh_ref,
                    attn_ref, cov_out_ref, hid_ref, ctx_ref):
    f32 = jnp.float32
    emb = emb_ref[...]                                     # (B, E)
    h_prev = hprev_ref[...]                                # (B, H)
    cov = cov_ref[...]                                     # (B, S)
    enc = enc_ref[...]                                     # (B, S, H)
    B, S, H = enc.shape

    # ---- attention scores: e = v . tanh(Wh*enc + Ws*emb + wc*cov + b) -------
    # enc_proj (= enc @ Wh) is loop-invariant across decode steps; it is
    # precomputed in the wrapper and streamed in bf16 (perf feedback #1/#7).
    dec_proj = jnp.dot(emb, ws_ref[...], preferred_element_type=f32)   # (B, H)
    feat = jnp.tanh(encp_ref[...].astype(f32)
                    + dec_proj[:, None, :]
                    + cov[:, :, None] * wc_ref[...][None, :, :]
                    + battn_ref[...][None, :, :])                      # (B, S, H)
    e = jnp.sum(feat * v_ref[...][None, :, :], axis=2)                 # (B, S)
    e = e + bias_ref[...]        # precomputed additive mask (0 / -1e30)

    # ---- masked softmax (mask already folded into the additive bias) --------
    e_max = jnp.max(e, axis=1, keepdims=True)
    p = jnp.exp(e - e_max)
    denom = jnp.maximum(jnp.sum(p, axis=1, keepdims=True), 1e-30)  # len>=1 guard
    attn = p * pl.reciprocal(denom, approx=False)                  # EUP, not VALU
    attn_ref[...] = attn
    cov_out_ref[...] = cov + attn

    # ---- context vector ------------------------------------------------------
    # TODO(synk): for large S this (and the scores above) should be tiled over
    # an S grid axis / pl.loop with running max-sum instead of whole-(B,S,H)
    # loads; the demo S is small so a single block is used.
    c = jnp.sum(attn[:, :, None] * enc, axis=1)                        # (B, H)

    # ---- GRU cell, fused gates (r,z,n stacked on the N dim -> 3 matmuls) ----
    gi = (jnp.dot(emb, wxh_ref[...], preferred_element_type=f32)
          + jnp.dot(c, wch_ref[...], preferred_element_type=f32)
          + bi_ref[...])                                               # (B, 3H)
    gh = jnp.dot(h_prev, whh_ref[...], preferred_element_type=f32) + bh_ref[...]
    r = jax.nn.sigmoid(gi[:, 0:H] + gh[:, 0:H])
    z = jax.nn.sigmoid(gi[:, H:2 * H] + gh[:, H:2 * H])
    n = jnp.tanh(gi[:, 2 * H:3 * H] + r * gh[:, 2 * H:3 * H])
    h_new = (1.0 - z) * n + z * h_prev                                 # (B, H)

    hid_ref[...] = h_new
    ctx_ref[...] = c


# ----------------------------------------------------------------------------
# Kernel B: V-tiled fused output projection (+ p_gen folded in as one column).
# ----------------------------------------------------------------------------
def out_proj_kernel(xcat_ref, w_ref, b_ref, o_ref):
    x = xcat_ref[...]                                     # (B, K_pad) f32, resident
    w = w_ref[...].astype(jnp.float32)                    # (K_pad, TN) streamed bf16
    o_ref[...] = jnp.dot(x, w, preferred_element_type=jnp.float32) + b_ref[...]


# ----------------------------------------------------------------------------
# Parameter preparation (one-time glue): fuse / pad / cast weights.
# ----------------------------------------------------------------------------
def prepare_params(params, tn=128):
    f32 = jnp.float32
    E, H = params["Ws"].shape
    V = params["b_out"].shape[-1]
    K = 2 * H + E
    K_pad = _round_up(K, 128)            # lane-dense x_cat / aligned weight rows
    V_tot = _round_up(V + 1, tn)         # +1 column carries the p_gen logit

    # GRU gates fused along N: (E,3H), (H,3H), (H,3H); biases (1,3H).
    w_xh = jnp.concatenate([params["W_ih"][0], params["W_ih"][1], params["W_ih"][2]], axis=1)
    w_ch = jnp.concatenate([params["W_ch"][0], params["W_ch"][1], params["W_ch"][2]], axis=1)
    w_hh = jnp.concatenate([params["W_hh"][0], params["W_hh"][1], params["W_hh"][2]], axis=1)
    b_i = params["b_ih"].reshape(1, 3 * H)
    b_h = params["b_hh"].reshape(1, 3 * H)

    # Fused output projection: rows = [h_new; c; emb; 0-pad], cols = [vocab | p_gen | 0-pad]
    w_voc = jnp.concatenate([params["Wo_h"], params["Wo_c"], params["Wo_e"]], axis=0)  # (K, V)
    w_gen = jnp.concatenate([params["Wg_h"], params["Wg_c"], params["Wg_e"]], axis=0)  # (K, 1)
    w_out = jnp.zeros((K_pad, V_tot), f32)
    w_out = w_out.at[:K, :V].set(w_voc)
    w_out = w_out.at[:K, V:V + 1].set(w_gen)
    b_out = jnp.zeros((1, V_tot), f32)
    b_out = b_out.at[:, :V].set(params["b_out"])
    b_out = b_out.at[:, V].set(params["b_gen"][0, 0])

    return dict(
        embedding=params["embedding"].astype(f32),
        Wh=params["Wh"].astype(f32), Ws=params["Ws"].astype(f32),
        wc=params["wc"].astype(f32), b_attn=params["b_attn"].astype(f32),
        v=params["v"].astype(f32),
        W_xh=w_xh.astype(f32), W_ch=w_ch.astype(f32), W_hh=w_hh.astype(f32),
        b_i=b_i.astype(f32), b_h=b_h.astype(f32),
        # bf16 streaming of the HBM-dominant fused weight; f32 accumulate in-kernel.
        W_out=w_out.astype(jnp.bfloat16),
        b_out_full=b_out,
        dims=dict(E=E, H=H, V=V, K=K, K_pad=K_pad, V_tot=V_tot, tn=tn),
    )


# ----------------------------------------------------------------------------
# Decoder forward (one decode step)
# ----------------------------------------------------------------------------
def decoder_forward(prep, dec_input, prev_hidden, enc_output, text_lengths,
                    coverage_vector):
    f32 = jnp.float32
    d = prep["dims"]
    E, H, V = d["E"], d["H"], d["V"]
    K, K_pad, V_tot, tn = d["K"], d["K_pad"], d["V_tot"], d["tn"]
    B, S, _ = enc_output.shape

    # ---- per-call glue -------------------------------------------------------
    embedded = prep["embedding"][dec_input].astype(f32)                # (B, E) gather
    enc_output = enc_output.astype(f32)
    # Loop-invariant encoder projection, hoisted out of the decode-step kernel.
    # TODO(synk): in the full PGN decode loop compute enc_proj / mask_bias ONCE
    # per sequence, not once per step (they do not depend on dec_input).
    enc_proj = jnp.dot(enc_output.reshape(B * S, H), prep["Wh"],
                       preferred_element_type=f32).reshape(B, S, H)
    enc_proj = enc_proj.astype(jnp.bfloat16)
    lengths = jnp.maximum(text_lengths.astype(jnp.int32), 1).reshape(B, 1)
    pos = jax.lax.broadcasted_iota(jnp.int32, (B, S), 1)
    mask_bias = jnp.where(pos < lengths, 0.0, NEG_INF).astype(f32)     # (B, S)

    vmem = pl.BlockSpec(memory_space=pltpu.MemorySpace.VMEM)

    # ---- kernel A: attention + coverage + GRU --------------------------------
    attn, cov_new, h_new, ctx = pl.pallas_call(
        attn_gru_kernel,
        out_shape=(
            jax.ShapeDtypeStruct((B, S), f32),    # attention weights
            jax.ShapeDtypeStruct((B, S), f32),    # updated coverage
            jax.ShapeDtypeStruct((B, H), f32),    # new GRU hidden
            jax.ShapeDtypeStruct((B, H), f32),    # context vector
        ),
        in_specs=[vmem] * 15,
        out_specs=(vmem, vmem, vmem, vmem),
    )(embedded, enc_output, enc_proj, prev_hidden.astype(f32),
      coverage_vector.astype(f32), mask_bias,
      prep["Ws"], prep["wc"], prep["b_attn"], prep["v"],
      prep["W_xh"], prep["W_ch"], prep["W_hh"], prep["b_i"], prep["b_h"])

    # ---- glue: pack lane-dense x_cat = [h_new, c, emb, 0-pad] ----------------
    x_cat = jnp.concatenate(
        [h_new, ctx, embedded, jnp.zeros((B, K_pad - K), f32)], axis=1)  # (B, K_pad)

    # ---- kernel B: V-tiled fused output projection ---------------------------
    n_tiles = V_tot // tn
    cost = pl.CostEstimate(
        flops=2 * B * K_pad * V_tot,
        transcendentals=0,
        bytes_accessed=(K_pad * V_tot * 2 + B * K_pad * 4
                        + V_tot * 4 + B * V_tot * 4))
    # NOTE: pick tn so 2 (double-buffer) * K_pad*tn*2B weight tiles stay well
    # under the scoped-VMEM limit (half of v5e/v6e budget on v7x's 64 MiB VMEM).
    logits_full = pl.pallas_call(
        out_proj_kernel,
        out_shape=jax.ShapeDtypeStruct((B, V_tot), f32),
        grid=(n_tiles,),
        in_specs=[
            pl.BlockSpec((B, K_pad), lambda j: (0, 0)),     # resident activations
            pl.BlockSpec((K_pad, tn), lambda j: (0, j)),    # streamed bf16 weight
            pl.BlockSpec((1, tn), lambda j: (0, j)),        # bias tile
        ],
        out_specs=pl.BlockSpec((B, tn), lambda j: (0, j)),
        compiler_params=pltpu.CompilerParams(
            dimension_semantics=("parallel",)),             # shards over v7x's 2 TCs
        cost_estimate=cost,
    )(x_cat, prep["W_out"], prep["b_out_full"])

    dec_output = logits_full[:, :V]                      # raw vocab logits
    # p_gen uses the post-GRU hidden state, exactly as in the PyTorch module.
    p_gen = jax.nn.sigmoid(logits_full[:, V:V + 1])      # folded-in gate column
    return dec_output, h_new, attn, p_gen, cov_new


# ----------------------------------------------------------------------------
# Pure-JAX reference (same prepared parameters, no Pallas)
# ----------------------------------------------------------------------------
def decoder_reference(prep, dec_input, prev_hidden, enc_output, text_lengths,
                      coverage_vector):
    f32 = jnp.float32
    d = prep["dims"]
    E, H, V, K, K_pad = d["E"], d["H"], d["V"], d["K"], d["K_pad"]
    B, S, _ = enc_output.shape

    emb = prep["embedding"][dec_input].astype(f32)
    enc = enc_output.astype(f32)
    h_prev = prev_hidden.astype(f32)
    cov = coverage_vector.astype(f32)

    enc_proj = jnp.dot(enc.reshape(B * S, H), prep["Wh"],
                       preferred_element_type=f32).reshape(B, S, H)
    enc_proj = enc_proj.astype(jnp.bfloat16).astype(f32)   # same rounding as kernel path
    lengths = jnp.maximum(text_lengths.astype(jnp.int32), 1).reshape(B, 1)
    pos = jax.lax.broadcasted_iota(jnp.int32, (B, S), 1)
    bias = jnp.where(pos < lengths, 0.0, NEG_INF).astype(f32)

    dec_proj = jnp.dot(emb, prep["Ws"], preferred_element_type=f32)
    feat = jnp.tanh(enc_proj + dec_proj[:, None, :]
                    + cov[:, :, None] * prep["wc"][None, :, :]
                    + prep["b_attn"][None, :, :])
    e = jnp.sum(feat * prep["v"][None, :, :], axis=2) + bias
    e_max = jnp.max(e, axis=1, keepdims=True)
    p = jnp.exp(e - e_max)
    denom = jnp.maximum(jnp.sum(p, axis=1, keepdims=True), 1e-30)
    attn = p / denom
    cov_new = cov + attn

    c = jnp.sum(attn[:, :, None] * enc, axis=1)

    gi = (jnp.dot(emb, prep["W_xh"], preferred_element_type=f32)
          + jnp.dot(c, prep["W_ch"], preferred_element_type=f32) + prep["b_i"])
    gh = jnp.dot(h_prev, prep["W_hh"], preferred_element_type=f32) + prep["b_h"]
    r = jax.nn.sigmoid(gi[:, 0:H] + gh[:, 0:H])
    z = jax.nn.sigmoid(gi[:, H:2 * H] + gh[:, H:2 * H])
    n = jnp.tanh(gi[:, 2 * H:3 * H] + r * gh[:, 2 * H:3 * H])
    h_new = (1.0 - z) * n + z * h_prev

    x_cat = jnp.concatenate([h_new, c, emb, jnp.zeros((B, K_pad - K), f32)], axis=1)
    logits_full = jnp.dot(x_cat, prep["W_out"].astype(f32),
                          preferred_element_type=f32) + prep["b_out_full"]
    dec_output = logits_full[:, :V]
    p_gen = jax.nn.sigmoid(logits_full[:, V:V + 1])
    return dec_output, h_new, attn, p_gen, cov_new


# ----------------------------------------------------------------------------
# Deterministic parameter init (shapes implied by the module's __init__)
# ----------------------------------------------------------------------------
def init_params(key, vocab_size, emb_size, hidden_size, pad_idx=0):
    ks = jax.random.split(key, 20)
    s = 0.1
    E, H, V = emb_size, hidden_size, vocab_size

    embedding = s * jax.random.normal(ks[0], (V, E), jnp.float32)
    embedding = embedding.at[pad_idx].set(0.0)                 # padding_idx row = 0

    return dict(
        embedding=embedding,
        # attention (Bahdanau + coverage); v's bias is omitted (cancels in softmax)
        Wh=s * jax.random.normal(ks[1], (H, H), jnp.float32),
        Ws=s * jax.random.normal(ks[2], (E, H), jnp.float32),
        wc=s * jax.random.normal(ks[3], (1, H), jnp.float32),
        b_attn=s * jax.random.normal(ks[4], (1, H), jnp.float32),
        v=s * jax.random.normal(ks[5], (1, H), jnp.float32),
        # GRU: input = cat(embedded, c); gates stacked along axis 0 as (r, z, n)
        W_ih=s * jax.random.normal(ks[6], (3, E, H), jnp.float32),
        W_ch=s * jax.random.normal(ks[7], (3, H, H), jnp.float32),
        W_hh=s * jax.random.normal(ks[8], (3, H, H), jnp.float32),
        b_ih=s * jax.random.normal(ks[9], (3, 1, H), jnp.float32),
        b_hh=s * jax.random.normal(ks[10], (3, 1, H), jnp.float32),
        # linear: cat(dec_output, c, embedded) -> V
        Wo_h=s * jax.random.normal(ks[11], (H, V), jnp.float32),
        Wo_c=s * jax.random.normal(ks[12], (H, V), jnp.float32),
        Wo_e=s * jax.random.normal(ks[13], (E, V), jnp.float32),
        b_out=s * jax.random.normal(ks[14], (1, V), jnp.float32),
        # w_gen: cat(dec_hidden, c, embedded) -> 1
        Wg_h=s * jax.random.normal(ks[15], (H, 1), jnp.float32),
        Wg_c=s * jax.random.normal(ks[16], (H, 1), jnp.float32),
        Wg_e=s * jax.random.normal(ks[17], (E, 1), jnp.float32),
        b_gen=s * jax.random.normal(ks[18], (1, 1), jnp.float32),
    )


if __name__ == "__main__":
    B, S, E, H, V = 4, 16, 32, 32, 500    # V padded to 512 (incl. p_gen column)

    key = jax.random.PRNGKey(0)
    kp, k1, k2, k3, k4 = jax.random.split(key, 5)

    params = init_params(kp, vocab_size=V, emb_size=E, hidden_size=H, pad_idx=0)
    prep = prepare_params(params, tn=128)   # grid of 4 vocab tiles

    dec_input = jax.random.randint(k4, (B,), 0, V).astype(jnp.int32)       # (B,)
    prev_hidden = 0.1 * jax.random.normal(k1, (B, H), jnp.float32)         # (B, H)
    enc_output = 0.1 * jax.random.normal(k2, (B, S, H), jnp.float32)       # (B, S, H)
    text_lengths = jnp.array([S, 11, 3, 7], dtype=jnp.int32)               # (B,)
    coverage_vector = 0.05 * jnp.abs(jax.random.normal(k3, (B, S), jnp.float32))

    outs = decoder_forward(prep, dec_input, prev_hidden, enc_output,
                           text_lengths, coverage_vector)
    outs = jax.block_until_ready(outs)

    refs = decoder_reference(prep, dec_input, prev_hidden, enc_output,
                             text_lengths, coverage_vector)

    names = ["dec_output", "dec_hidden", "attention_weights", "p_gen", "coverage"]
    for name, got, want in zip(names, outs, refs):
        assert got.shape == want.shape, (name, got.shape, want.shape)
        if not jnp.allclose(got, want, atol=5e-4, rtol=5e-4):
            err = float(jnp.max(jnp.abs(got - want)))
            raise AssertionError(f"mismatch in {name}: max abs err {err}")

    print("KERNEL_OK")
</pallas_src>

<mosaic_0001>
module attributes {stable_mosaic.version = 11 : i64} {
  func.func @attn_gru_kernel(%arg0: memref<4x32xf32, #tpu.memory_space<vmem>>, %arg1: memref<4x16x32xf32, #tpu.memory_space<vmem>>, %arg2: memref<4x16x32xbf16, #tpu.memory_space<vmem>>, %arg3: memref<4x32xf32, #tpu.memory_space<vmem>>, %arg4: memref<4x16xf32, #tpu.memory_space<vmem>>, %arg5: memref<4x16xf32, #tpu.memory_space<vmem>>, %arg6: memref<32x32xf32, #tpu.memory_space<vmem>>, %arg7: memref<1x32xf32, #tpu.memory_space<vmem>>, %arg8: memref<1x32xf32, #tpu.memory_space<vmem>>, %arg9: memref<1x32xf32, #tpu.memory_space<vmem>>, %arg10: memref<32x96xf32, #tpu.memory_space<vmem>>, %arg11: memref<32x96xf32, #tpu.memory_space<vmem>>, %arg12: memref<32x96xf32, #tpu.memory_space<vmem>>, %arg13: memref<1x96xf32, #tpu.memory_space<vmem>>, %arg14: memref<1x96xf32, #tpu.memory_space<vmem>>, %arg15: memref<4x16xf32, #tpu.memory_space<vmem>>, %arg16: memref<4x16xf32, #tpu.memory_space<vmem>>, %arg17: memref<4x32xf32, #tpu.memory_space<vmem>>, %arg18: memref<4x32xf32, #tpu.memory_space<vmem>>) attributes {dimension_semantics = [], scalar_prefetch = 0 : i64, scratch_operands = 0 : i64, tpu.core_type = #tpu.core_type<tc>} {
    %c0 = arith.constant 0 : index
    %c0_0 = arith.constant 0 : index
    %0 = vector.load %arg0[%c0, %c0_0] : memref<4x32xf32, #tpu.memory_space<vmem>>, vector<4x32xf32>
    %c0_1 = arith.constant 0 : index
    %c0_2 = arith.constant 0 : index
    %1 = vector.load %arg3[%c0_1, %c0_2] : memref<4x32xf32, #tpu.memory_space<vmem>>, vector<4x32xf32>
    %c0_3 = arith.constant 0 : index
    %c0_4 = arith.constant 0 : index
    %2 = vector.load %arg4[%c0_3, %c0_4] : memref<4x16xf32, #tpu.memory_space<vmem>>, vector<4x16xf32>
    %c0_5 = arith.constant 0 : index
    %c0_6 = arith.constant 0 : index
    %c0_7 = arith.constant 0 : index
    %3 = vector.load %arg1[%c0_5, %c0_6, %c0_7] : memref<4x16x32xf32, #tpu.memory_space<vmem>>, vector<4x16x32xf32>
    %c0_8 = arith.constant 0 : index
    %c0_9 = arith.constant 0 : index
    %4 = vector.load %arg6[%c0_8, %c0_9] : memref<32x32xf32, #tpu.memory_space<vmem>>, vector<32x32xf32>
    %cst = arith.constant dense<0.000000e+00> : vector<4x32xf32>
    %5 = tpu.matmul %0, %4, %cst {dimension_numbers = #tpu.dot_dimension_numbers<[1], [0], [0], [1], [0, 0, 1, 1], [], []>} : vector<4x32xf32>, vector<32x32xf32>, vector<4x32xf32> -> vector<4x32xf32>
    %c0_10 = arith.constant 0 : index
    %c0_11 = arith.constant 0 : index
    %c0_12 = arith.constant 0 : index
    %6 = vector.load %arg2[%c0_10, %c0_11, %c0_12] : memref<4x16x32xbf16, #tpu.memory_space<vmem>>, vector<4x16x32xbf16>
    %7 = arith.extf %6 : vector<4x16x32xbf16> to vector<4x16x32xf32>
    %8 = vector.shape_cast %5 : vector<4x32xf32> to vector<4x1x32xf32>
    %9 = vector.broadcast %8 : vector<4x1x32xf32> to vector<4x16x32xf32>
    %10 = arith.addf %7, %9 : vector<4x16x32xf32>
    %11 = vector.shape_cast %2 : vector<4x16xf32> to vector<4x16x1xf32>
    %c0_13 = arith.constant 0 : index
    %c0_14 = arith.constant 0 : index
    %12 = vector.load %arg7[%c0_13, %c0_14] : memref<1x32xf32, #tpu.memory_space<vmem>>, vector<1x32xf32>
    %13 = vector.shape_cast %12 : vector<1x32xf32> to vector<1x1x32xf32>
    %14 = vector.broadcast %11 : vector<4x16x1xf32> to vector<4x16x32xf32>
    %15 = vector.broadcast %13 : vector<1x1x32xf32> to vector<4x16x32xf32>
    %16 = arith.mulf %14, %15 : vector<4x16x32xf32>
    %17 = arith.addf %10, %16 : vector<4x16x32xf32>
    %c0_15 = arith.constant 0 : index
    %c0_16 = arith.constant 0 : index
    %18 = vector.load %arg8[%c0_15, %c0_16] : memref<1x32xf32, #tpu.memory_space<vmem>>, vector<1x32xf32>
    %19 = vector.shape_cast %18 : vector<1x32xf32> to vector<1x1x32xf32>
    %20 = vector.broadcast %19 : vector<1x1x32xf32> to vector<4x16x32xf32>
    %21 = arith.addf %17, %20 : vector<4x16x32xf32>
    %22 = math.tanh %21 : vector<4x16x32xf32>
    %c0_17 = arith.constant 0 : index
    %c0_18 = arith.constant 0 : index
    %23 = vector.load %arg9[%c0_17, %c0_18] : memref<1x32xf32, #tpu.memory_space<vmem>>, vector<1x32xf32>
    %24 = vector.shape_cast %23 : vector<1x32xf32> to vector<1x1x32xf32>
    %25 = vector.broadcast %24 : vector<1x1x32xf32> to vector<4x16x32xf32>
    %26 = arith.mulf %22, %25 : vector<4x16x32xf32>
    %cst_19 = arith.constant dense<0.000000e+00> : vector<4x16xf32>
    %27 = vector.multi_reduction <add>, %26, %cst_19 [2] : vector<4x16x32xf32> to vector<4x16xf32>
    %c0_20 = arith.constant 0 : index
    %c0_21 = arith.constant 0 : index
    %28 = vector.load %arg5[%c0_20, %c0_21] : memref<4x16xf32, #tpu.memory_space<vmem>>, vector<4x16xf32>
    %29 = arith.addf %27, %28 : vector<4x16xf32>
    %cst_22 = arith.constant dense<0xFF800000> : vector<4xf32>
    %30 = vector.multi_reduction <maximumf>, %29, %cst_22 [1] : vector<4x16xf32> to vector<4xf32>
    %31 = vector.shape_cast %30 : vector<4xf32> to vector<4x1xf32>
    %32 = vector.broadcast %31 : vector<4x1xf32> to vector<4x16xf32>
    %33 = arith.subf %29, %32 : vector<4x16xf32>
    %34 = math.exp %33 : vector<4x16xf32>
    %cst_23 = arith.constant dense<0.000000e+00> : vector<4xf32>
    %35 = vector.multi_reduction <add>, %34, %cst_23 [1] : vector<4x16xf32> to vector<4xf32>
    %36 = vector.shape_cast %35 : vector<4xf32> to vector<4x1xf32>
    %cst_24 = arith.constant 1.000000e-30 : f32
    %37 = vector.broadcast %cst_24 : f32 to vector<4x1xf32>
    %38 = arith.maximumf %36, %37 : vector<4x1xf32>
    %39 = tpu.reciprocal %38 : vector<4x1xf32> -> vector<4x1xf32>
    %40 = vector.broadcast %39 : vector<4x1xf32> to vector<4x16xf32>
    %41 = arith.mulf %34, %40 : vector<4x16xf32>
    %c0_25 = arith.constant 0 : index
    %c0_26 = arith.constant 0 : index
    %42 = vector.load %arg15[%c0_25, %c0_26] : memref<4x16xf32, #tpu.memory_space<vmem>>, vector<4x16xf32>
    tpu.vector_store %arg15[%c0_25, %c0_26], %41 {strides = array<i32>} : memref<4x16xf32, #tpu.memory_space<vmem>>, vector<4x16xf32>,
    %43 = arith.addf %2, %41 : vector<4x16xf32>
    %c0_27 = arith.constant 0 : index
    %c0_28 = arith.constant 0 : index
    %44 = vector.load %arg16[%c0_27, %c0_28] : memref<4x16xf32, #tpu.memory_space<vmem>>, vector<4x16xf32>
    tpu.vector_store %arg16[%c0_27, %c0_28], %43 {strides = array<i32>} : memref<4x16xf32, #tpu.memory_space<vmem>>, vector<4x16xf32>,
    %45 = vector.shape_cast %41 : vector<4x16xf32> to vector<4x16x1xf32>
    %46 = vector.broadcast %45 : vector<4x16x1xf32> to vector<4x16x32xf32>
    %47 = arith.mulf %46, %3 : vector<4x16x32xf32>
    %cst_29 = arith.constant dense<0.000000e+00> : vector<4x32xf32>
    %48 = vector.multi_reduction <add>, %47, %cst_29 [1] : vector<4x16x32xf32> to vector<4x32xf32>
    %c0_30 = arith.constant 0 : index
    %c0_31 = arith.constant 0 : index
    %49 = vector.load %arg10[%c0_30, %c0_31] : memref<32x96xf32, #tpu.memory_space<vmem>>, vector<32x96xf32>
    %cst_32 = arith.constant dense<0.000000e+00> : vector<4x96xf32>
    %50 = tpu.matmul %0, %49, %cst_32 {dimension_numbers = #tpu.dot_dimension_numbers<[1], [0], [0], [1], [0, 0, 1, 1], [], []>} : vector<4x32xf32>, vector<32x96xf32>, vector<4x96xf32> -> vector<4x96xf32>
    %c0_33 = arith.constant 0 : index
    %c0_34 = arith.constant 0 : index
    %51 = vector.load %arg11[%c0_33, %c0_34] : memref<32x96xf32, #tpu.memory_space<vmem>>, vector<32x96xf32>
    %cst_35 = arith.constant dense<0.000000e+00> : vector<4x96xf32>
    %52 = tpu.matmul %48, %51, %cst_35 {dimension_numbers = #tpu.dot_dimension_numbers<[1], [0], [0], [1], [0, 0, 1, 1], [], []>} : vector<4x32xf32>, vector<32x96xf32>, vector<4x96xf32> -> vector<4x96xf32>
    %53 = arith.addf %50, %52 : vector<4x96xf32>
    %c0_36 = arith.constant 0 : index
    %c0_37 = arith.constant 0 : index
    %54 = vector.load %arg13[%c0_36, %c0_37] : memref<1x96xf32, #tpu.memory_space<vmem>>, vector<1x96xf32>
    %55 = vector.broadcast %54 : vector<1x96xf32> to vector<4x96xf32>
    %56 = arith.addf %53, %55 : vector<4x96xf32>
    %c0_38 = arith.constant 0 : index
    %c0_39 = arith.constant 0 : index
    %57 = vector.load %arg12[%c0_38, %c0_39] : memref<32x96xf32, #tpu.memory_space<vmem>>, vector<32x96xf32>
    %cst_40 = arith.constant dense<0.000000e+00> : vector<4x96xf32>
    %58 = tpu.matmul %1, %57, %cst_40 {dimension_numbers = #tpu.dot_dimension_numbers<[1], [0], [0], [1], [0, 0, 1, 1], [], []>} : vector<4x32xf32>, vector<32x96xf32>, vector<4x96xf32> -> vector<4x96xf32>
    %c0_41 = arith.constant 0 : index
    %c0_42 = arith.constant 0 : index
    %59 = vector.load %arg14[%c0_41, %c0_42] : memref<1x96xf32, #tpu.memory_space<vmem>>, vector<1x96xf32>
    %60 = vector.broadcast %59 : vector<1x96xf32> to vector<4x96xf32>
    %61 = arith.addf %58, %60 : vector<4x96xf32>
    %62 = vector.extract_strided_slice %56 {offsets = [0, 0], sizes = [4, 32], strides = [1, 1]} : vector<4x96xf32> to vector<4x32xf32>
    %63 = vector.extract_strided_slice %61 {offsets = [0, 0], sizes = [4, 32], strides = [1, 1]} : vector<4x96xf32> to vector<4x32xf32>
    %64 = arith.addf %62, %63 : vector<4x32xf32>
    %65 = arith.negf %64 : vector<4x32xf32>
    %66 = math.exp %65 : vector<4x32xf32>
    %cst_43 = arith.constant 1.000000e+00 : f32
    %67 = vector.broadcast %cst_43 : f32 to vector<4x32xf32>
    %68 = arith.addf %67, %66 : vector<4x32xf32>
    %69 = arith.divf %67, %68 : vector<4x32xf32>
    %70 = vector.extract_strided_slice %56 {offsets = [0, 32], sizes = [4, 32], strides = [1, 1]} : vector<4x96xf32> to vector<4x32xf32>
    %71 = vector.extract_strided_slice %61 {offsets = [0, 32], sizes = [4, 32], strides = [1, 1]} : vector<4x96xf32> to vector<4x32xf32>
    %72 = arith.addf %70, %71 : vector<4x32xf32>
    %73 = arith.negf %72 : vector<4x32xf32>
    %74 = math.exp %73 : vector<4x32xf32>
    %cst_44 = arith.constant 1.000000e+00 : f32
    %75 = vector.broadcast %cst_44 : f32 to vector<4x32xf32>
    %76 = arith.addf %75, %74 : vector<4x32xf32>
    %77 = arith.divf %75, %76 : vector<4x32xf32>
    %78 = vector.extract_strided_slice %56 {offsets = [0, 64], sizes = [4, 32], strides = [1, 1]} : vector<4x96xf32> to vector<4x32xf32>
    %79 = vector.extract_strided_slice %61 {offsets = [0, 64], sizes = [4, 32], strides = [1, 1]} : vector<4x96xf32> to vector<4x32xf32>
    %80 = arith.mulf %69, %79 : vector<4x32xf32>
    %81 = arith.addf %78, %80 : vector<4x32xf32>
    %82 = math.tanh %81 : vector<4x32xf32>
    %cst_45 = arith.constant 1.000000e+00 : f32
    %83 = vector.broadcast %cst_45 : f32 to vector<4x32xf32>
    %84 = arith.subf %83, %77 : vector<4x32xf32>
    %85 = arith.mulf %84, %82 : vector<4x32xf32>
    %86 = arith.mulf %77, %1 : vector<4x32xf32>
    %87 = arith.addf %85, %86 : vector<4x32xf32>
    %c0_46 = arith.constant 0 : index
    %c0_47 = arith.constant 0 : index
    %88 = vector.load %arg17[%c0_46, %c0_47] : memref<4x32xf32, #tpu.memory_space<vmem>>, vector<4x32xf32>
    tpu.vector_store %arg17[%c0_46, %c0_47], %87 {strides = array<i32>} : memref<4x32xf32, #tpu.memory_space<vmem>>, vector<4x32xf32>,
    %c0_48 = arith.constant 0 : index
    %c0_49 = arith.constant 0 : index
    %89 = vector.load %arg18[%c0_48, %c0_49] : memref<4x32xf32, #tpu.memory_space<vmem>>, vector<4x32xf32>
    tpu.vector_store %arg18[%c0_48, %c0_49], %48 {strides = array<i32>} : memref<4x32xf32, #tpu.memory_space<vmem>>, vector<4x32xf32>,
    return
  }
}

</mosaic_0001>

<bundles_post_ra>
// kernel: tpu_custom_call.1
= control target key start
LH: loop header
LB: loop body
LE: loop exit
PB: predicated region body
PF: predicated region fallthrough
CT: control target
= control target key end

     0   :  { %s2278_s0 = inlined_call_operand.hbm [shape: f32[4,32], index: 0, kind: input, shape index: {}]   ;;  %s2279_s1 = inlined_call_operand.hbm [shape: f32[4,16,32], index: 1, kind: input, shape index: {}]   ;;  %s2280_s2 = inlined_call_operand.hbm [shape: bf16[4,16,32], index: 2, kind: input, shape index: {}]   ;;  %s2281_s3 = inlined_call_operand.vmem [shape: f32[4,32], index: 3, kind: input, shape index: {}]   ;;  %s2282_s4 = inlined_call_operand.hbm [shape: f32[4,16], index: 4, kind: input, shape index: {}]   ;;  %s2283_s5 = inlined_call_operand.hbm [shape: f32[4,16], index: 5, kind: input, shape index: {}]   ;;  %s2284_s6 = inlined_call_operand.hbm [shape: f32[32,32], index: 6, kind: input, shape index: {}]   ;;  %s2285_s7 = inlined_call_operand.vmem [shape: f32[1,32], index: 7, kind: input, shape index: {}]   ;;  %s2286_s8 = inlined_call_operand.hbm [shape: f32[1,32], index: 8, kind: input, shape index: {}]   ;;  %s2287_s9 = inlined_call_operand.hbm [shape: f32[1,32], index: 9, kind: input, shape index: {}]   ;;  %s2288_s10 = inlined_call_operand.vmem [shape: f32[32,96], index: 10, kind: input, shape index: {}]   ;;  %s2289_s11 = inlined_call_operand.hbm [shape: f32[32,96], index: 11, kind: input, shape index: {}]   ;;  %s2290_s12 = inlined_call_operand.hbm [shape: f32[32,96], index: 12, kind: input, shape index: {}]   ;;  %s2291_s13 = inlined_call_operand.vmem [shape: f32[1,96], index: 13, kind: input, shape index: {}]   ;;  %s2292_s14 = inlined_call_operand.vmem [shape: f32[1,96], index: 14, kind: input, shape index: {}]   ;;  %s2293_s15 = inlined_call_operand.hbm [shape: f32[4,16], index: 15, kind: output, shape index: {0}]   ;;  %s2294_s16 = inlined_call_operand.hbm [shape: f32[4,16], index: 16, kind: output, shape index: {1}]   ;;  %s2295_s17 = inlined_call_operand.hbm [shape: f32[4,32], index: 17, kind: output, shape index: {2}]   ;;  %s2296_s18 = inlined_call_operand.hbm [shape: f32[4,32], index: 18, kind: output, shape index: {3}]  }
   0x1   :  { %2302 = sst [smem:[#allocation34_spill]] %s2278_s0 }
   0x2   :  { %2303 = sst [smem:[#allocation35_spill]] %s2279_s1 }
   0x3   :  { %2304 = sst [smem:[#allocation36_spill]] %s2280_s2 }
   0x4   :  { %2305 = sst [smem:[#allocation37_spill]] %s2295_s17 }
   0x5   :  { %2306 = sst [smem:[#allocation38_spill]] %s2296_s18 }
   0x6   :  { %24 = vsyncpa [#allocation3], 0 }
   0x7   :  { %25 = vsyncpa [#allocation6], 0 }
   0x8   :  { %26 = vsyncpa [#allocation9], 0 }
   0x9   :  { %27 = vsyncpa [#allocation12], 0 }
   0xa   :  { %28 = vsyncpa [#allocation15], 0 }
   0xb   :  { %29 = vsyncpa [#allocation18], 0 }
   0xc   :  { %30 = vsyncpa [#allocation4], 0 }
   0xd   :  { %31 = vsyncpa [#allocation21], 0 }
   0xe   :  { %32 = vsyncpa [#allocation24], 0  ;;  %s1750_s27 = smov [#allocation5]   ;;  %s2307_s0 = sld [smem:[#allocation35_spill]] }
   0xf   :  { %s48_s28 = sshll.u32 %s1750_s27, 4  ;;  %s49_s28 = int_to_ptr.vmem [resolvable:$true] %s48_s28 }
  0x14   :  { %s1424_s19 = scalar_lea.hbm %s2307_s0, 1024 }
  0x15   :  { %p1425_p0 = scmp.ne.s32.totalorder %s2307_s0, %s1424_s19  ;;  %p1428_p1 = scmp.lt.u32.totalorder %s1424_s19, %s2307_s0 }
  0x17   :  { %p1430_p2 = pnand %p1428_p1, %p1425_p0 }
  0x19   :  { %1433 = shalt.err (!%p1430_p2)
}
  0x1a   :  { %s1434_s2 = scalar_lea.vmem %s49_s28, 1024  ;;  %p1439_p4 = scmp.lt.s32.totalorder %s49_s28, %s49_s28 }
  0x1b   :  { %p1435_p3 = scmp.ne.s32.totalorder %s49_s28, %s1434_s2  ;;  %p1440_p5 = scmp.lt.s32.totalorder %s1434_s2, %s1434_s2 }
  0x1d   :  { %p1441_p6 = por %p1440_p5, %p1439_p4 }
  0x1f   :  { %p1442_p7 = pnand %p1441_p6, %p1435_p3 }
  0x21   :  { %1445 = shalt.err (!%p1442_p7)
}
  0x22   :  { %s1751_s23 = smov 128   ;;  %s1752_s24 = smov 8  }
  0x23   :  { %54 = dma.hbm_to_vmem [thread:$0]  %s2307_s0, 1024, %s49_s28, [#allocation6], %s1751_s23, %s1751_s23, %s1752_s24  }
  0x24   :  { %s1753_s27 = smov [#allocation8]   ;;  %s1754_s30 = smov [#allocation11]  }
  0x25   :  { %s75_s29 = sshll.u32 %s1753_s27, 4  ;;  %s94_s19 = sshll.u32 %s1754_s30, 4  ;;  %s76_s29 = int_to_ptr.vmem [resolvable:$true] %s75_s29  ;;  %s95_s19 = int_to_ptr.vmem [resolvable:$true] %s94_s19 }
  0x26   :  { %s1446_s21 = scalar_lea.hbm %s2282_s4, 64 }
  0x27   :  { %p1447_p8 = scmp.ne.s32.totalorder %s2282_s4, %s1446_s21  ;;  %p1450_p9 = scmp.lt.u32.totalorder %s1446_s21, %s2282_s4 }
  0x29   :  { %p1452_p10 = pnand %p1450_p9, %p1447_p8 }
  0x2b   :  { %1455 = shalt.err (!%p1452_p10)
}
  0x2c   :  { %s1456_s28 = scalar_lea.vmem %s76_s29, 64  ;;  %p1461_p12 = scmp.lt.s32.totalorder %s76_s29, %s76_s29 }
  0x2d   :  { %p1457_p11 = scmp.ne.s32.totalorder %s76_s29, %s1456_s28  ;;  %p1462_p13 = scmp.lt.s32.totalorder %s1456_s28, %s1456_s28 }
  0x2f   :  { %p1463_p0 = por %p1462_p13, %p1461_p12 }
  0x31   :  { %p1464_p1 = pnand %p1463_p0, %p1457_p11 }
  0x33   :  { %1467 = shalt.err (!%p1464_p1)
}
  0x34   :  { %78 = dma.hbm_to_vmem [thread:$0]  %s2282_s4, 64, %s76_s29, [#allocation9]  }
  0x35   :  { %s1468_s30 = scalar_lea.hbm %s2284_s6, 512 }
  0x36   :  { %p1469_p2 = scmp.ne.s32.totalorder %s2284_s6, %s1468_s30  ;;  %p1472_p3 = scmp.lt.u32.totalorder %s1468_s30, %s2284_s6 }
  0x38   :  { %p1474_p4 = pnand %p1472_p3, %p1469_p2 }
  0x3a   :  { %1477 = shalt.err (!%p1474_p4)
}
  0x3b   :  { %s1478_s21 = scalar_lea.vmem %s95_s19, 512  ;;  %p1483_p6 = scmp.lt.s32.totalorder %s95_s19, %s95_s19 }
  0x3c   :  { %p1479_p5 = scmp.ne.s32.totalorder %s95_s19, %s1478_s21  ;;  %p1484_p7 = scmp.lt.s32.totalorder %s1478_s21, %s1478_s21 }
  0x3e   :  { %p1485_p8 = por %p1484_p7, %p1483_p6 }
  0x40   :  { %p1486_p9 = pnand %p1485_p8, %p1479_p5 }
  0x42   :  { %1489 = shalt.err (!%p1486_p9)
}
  0x43   :  { %100 = dma.hbm_to_vmem [thread:$0]  %s2284_s6, 512, %s95_s19, [#allocation12], %s1751_s23, %s1751_s23, %s1752_s24  }
  0x44   :  { %s1755_s22 = smov [#allocation14]   ;;  %s1756_s28 = smov [#allocation2]  }
  0x45   :  { %s119_s2 = sshll.u32 %s1755_s22, 4  ;;  %s39_s0 = sshll.u32 %s1756_s28, 4  ;;  %s120_s2 = int_to_ptr.vmem [resolvable:$true] %s119_s2  ;;  %s40_s0 = int_to_ptr.vmem [resolvable:$true] %s39_s0 }
  0x46   :  { %s1490_s27 = scalar_lea.hbm %s2287_s9, 16 }
  0x47   :  { %p1491_p10 = scmp.ne.s32.totalorder %s2287_s9, %s1490_s27  ;;  %p1494_p11 = scmp.lt.u32.totalorder %s1490_s27, %s2287_s9 }
  0x49   :  { %p1496_p12 = pnand %p1494_p11, %p1491_p10 }
  0x4b   :  { %1499 = shalt.err (!%p1496_p12)
}
  0x4c   :  { %s1500_s6 = scalar_lea.vmem %s120_s2, 16  ;;  %s1504_s19 = scalar_lea.vmem %s120_s2, 32 }
  0x4d   :  { %p1501_p13 = scmp.ne.s32.totalorder %s120_s2, %s1500_s6  ;;  %p1505_p0 = scmp.lt.s32.totalorder %s120_s2, %s120_s2 }
  0x4e   :  { %p1506_p1 = scmp.lt.s32.totalorder %s1504_s19, %s1500_s6 }
  0x50   :  { %p1507_p2 = por %p1506_p1, %p1505_p0 }
  0x52   :  { %p1508_p3 = pnand %p1507_p2, %p1501_p13 }
  0x54   :  { %1511 = shalt.err (!%p1508_p3)
}
  0x55   :  { %122 = dma.hbm_to_vmem [thread:$0]  %s2287_s9, 16, %s120_s2, [#allocation15]  }
  0x56   :  { %s2308_s22 = sld [smem:[#allocation34_spill]] }
  0x5c   :  { %s1512_s28 = scalar_lea.hbm %s2308_s22, 64 }
  0x5d   :  { %p1513_p4 = scmp.ne.s32.totalorder %s2308_s22, %s1512_s28  ;;  %p1516_p5 = scmp.lt.u32.totalorder %s1512_s28, %s2308_s22 }
  0x5f   :  { %p1518_p6 = pnand %p1516_p5, %p1513_p4 }
  0x61   :  { %1521 = shalt.err (!%p1518_p6)
}
  0x62   :  { %s1522_s17 = scalar_lea.vmem %s40_s0, 64  ;;  %p1527_p8 = scmp.lt.s32.totalorder %s40_s0, %s40_s0 }
  0x63   :  { %p1523_p7 = scmp.ne.s32.totalorder %s40_s0, %s1522_s17  ;;  %p1528_p9 = scmp.lt.s32.totalorder %s1522_s17, %s1522_s17 }
  0x65   :  { %p1529_p10 = por %p1528_p9, %p1527_p8 }
  0x67   :  { %p1530_p11 = pnand %p1529_p10, %p1523_p7 }
  0x69   :  { %1533 = shalt.err (!%p1530_p11)
}
  0x6a   :  { %42 = dma.hbm_to_vmem [thread:$0]  %s2308_s22, 64, %s40_s0, [#allocation3]  }
  0x6b   :  { %s1757_s18 = smov [#allocation7]   ;;  %s2309_s20 = sld [smem:[#allocation36_spill]] }
  0x6c   :  { %s60_s1 = sshll.u32 %s1757_s18, 4  ;;  %s61_s1 = int_to_ptr.vmem [resolvable:$true] %s60_s1 }
  0x71   :  { %s1534_s21 = scalar_lea.hbm %s2309_s20, 512 }
  0x72   :  { %p1535_p12 = scmp.ne.s32.totalorder %s2309_s20, %s1534_s21  ;;  %p1538_p13 = scmp.lt.u32.totalorder %s1534_s21, %s2309_s20 }
  0x74   :  { %p1540_p0 = pnand %p1538_p13, %p1535_p12 }
  0x76   :  { %1543 = shalt.err (!%p1540_p0)
}
  0x77   :  { %s1544_s26 = scalar_lea.vmem %s61_s1, 512  ;;  %p1549_p2 = scmp.lt.s32.totalorder %s61_s1, %s61_s1 }
  0x78   :  { %p1545_p1 = scmp.ne.s32.totalorder %s61_s1, %s1544_s26  ;;  %p1550_p3 = scmp.lt.s32.totalorder %s1544_s26, %s1544_s26 }
  0x7a   :  { %p1551_p4 = por %p1550_p3, %p1549_p2 }
  0x7c   :  { %p1552_p5 = pnand %p1551_p4, %p1545_p1 }
  0x7e   :  { %1555 = shalt.err (!%p1552_p5)
}
  0x7f   :  { %s1758_s0 = smov 64   ;;  %s1759_s22 = smov 4  }
  0x80   :  { %66 = dma.hbm_to_vmem [thread:$0]  %s2309_s20, 512, %s61_s1, [#allocation6], %s1758_s0, %s1758_s0, %s1759_s22  }
  0x81   :  { %s1760_s17 = smov [#allocation10]   ;;  %s1761_s2 = smov [#allocation13]  }
  0x82   :  { %s85_s9 = sshll.u32 %s1760_s17, 4  ;;  %s109_s18 = sshll.u32 %s1761_s2, 4  ;;  %s86_s9 = int_to_ptr.vmem [resolvable:$true] %s85_s9  ;;  %s110_s18 = int_to_ptr.vmem [resolvable:$true] %s109_s18 }
  0x83   :  { %s1556_s21 = scalar_lea.hbm %s2283_s5, 64 }
  0x84   :  { %p1557_p6 = scmp.ne.s32.totalorder %s2283_s5, %s1556_s21  ;;  %p1560_p7 = scmp.lt.u32.totalorder %s1556_s21, %s2283_s5 }
  0x86   :  { %p1562_p8 = pnand %p1560_p7, %p1557_p6 }
  0x88   :  { %1565 = shalt.err (!%p1562_p8)
}
  0x89   :  { %s1566_s1 = scalar_lea.vmem %s86_s9, 64  ;;  %p1571_p10 = scmp.lt.s32.totalorder %s86_s9, %s86_s9 }
  0x8a   :  { %p1567_p9 = scmp.ne.s32.totalorder %s86_s9, %s1566_s1  ;;  %p1572_p11 = scmp.lt.s32.totalorder %s1566_s1, %s1566_s1 }
  0x8c   :  { %p1573_p12 = por %p1572_p11, %p1571_p10 }
  0x8e   :  { %p1574_p13 = pnand %p1573_p12, %p1567_p9 }
  0x90   :  { %1577 = shalt.err (!%p1574_p13)
}
  0x91   :  { %88 = dma.hbm_to_vmem [thread:$0]  %s2283_s5, 64, %s86_s9, [#allocation9]  }
  0x92   :  { %s1578_s30 = scalar_lea.hbm %s2286_s8, 16 }
  0x93   :  { %p1579_p0 = scmp.ne.s32.totalorder %s2286_s8, %s1578_s30  ;;  %p1582_p1 = scmp.lt.u32.totalorder %s1578_s30, %s2286_s8 }
  0x95   :  { %p1584_p2 = pnand %p1582_p1, %p1579_p0 }
  0x97   :  { %1587 = shalt.err (!%p1584_p2)
}
  0x98   :  { %s1588_s21 = scalar_lea.vmem %s110_s18, 16  ;;  %s1592_s4 = scalar_lea.vmem %s110_s18, 32 }
  0x99   :  { %p1589_p3 = scmp.ne.s32.totalorder %s110_s18, %s1588_s21  ;;  %p1593_p4 = scmp.lt.s32.totalorder %s110_s18, %s110_s18 }
  0x9a   :  { %p1594_p5 = scmp.lt.s32.totalorder %s1592_s4, %s1588_s21 }
  0x9c   :  { %p1595_p6 = por %p1594_p5, %p1593_p4 }
  0x9e   :  { %p1596_p7 = pnand %p1595_p6, %p1589_p3 }
  0xa0   :  { %1599 = shalt.err (!%p1596_p7)
}
  0xa1   :  { %112 = dma.hbm_to_vmem [thread:$0]  %s2286_s8, 16, %s110_s18, [#allocation12]  }
  0xa2   :  { %s1762_s29 = smov [#allocation16]   ;;  %s1763_s25 = smov [#allocation17]  }
  0xa3   :  { %s130_s28 = sshll.u32 %s1762_s29, 4  ;;  %s142_s1 = sshll.u32 %s1763_s25, 4  ;;  %s131_s28 = int_to_ptr.vmem [resolvable:$true] %s130_s28  ;;  %s1974_s1 = int_to_ptr.vmem [resolvable:$true] %s142_s1 }
  0xa4   :  { %s1600_s22 = scalar_lea.hbm %s2289_s11, 512 }
  0xa5   :  { %p1601_p8 = scmp.ne.s32.totalorder %s2289_s11, %s1600_s22  ;;  %p1604_p9 = scmp.lt.u32.totalorder %s1600_s22, %s2289_s11 }
  0xa7   :  { %p1606_p10 = pnand %p1604_p9, %p1601_p8 }
  0xa9   :  { %1609 = shalt.err (!%p1606_p10)
}
  0xaa   :  { %s1610_s8 = scalar_lea.vmem %s131_s28, 512  ;;  %p1615_p12 = scmp.lt.s32.totalorder %s131_s28, %s131_s28 }
  0xab   :  { %p1611_p11 = scmp.ne.s32.totalorder %s131_s28, %s1610_s8  ;;  %p1616_p13 = scmp.lt.s32.totalorder %s1610_s8, %s1610_s8 }
  0xad   :  { %p1617_p0 = por %p1616_p13, %p1615_p12 }
  0xaf   :  { %p1618_p1 = pnand %p1617_p0, %p1611_p11 }
  0xb1   :  { %1621 = shalt.err (!%p1618_p1)
}
  0xb2   :  { %136 = dma.hbm_to_vmem [thread:$0]  %s2289_s11, 512, %s131_s28, [#allocation15], %s1751_s23, %s1751_s23, %s1752_s24  }
  0xb3   :  { %s1622_s4 = scalar_lea.hbm %s2290_s12, 512 }
  0xb4   :  { %p1623_p2 = scmp.ne.s32.totalorder %s2290_s12, %s1622_s4  ;;  %p1626_p3 = scmp.lt.u32.totalorder %s1622_s4, %s2290_s12 }
  0xb6   :  { %p1628_p4 = pnand %p1626_p3, %p1623_p2 }
  0xb8   :  { %1631 = shalt.err (!%p1628_p4)
}
  0xb9   :  { %s1632_s20 = scalar_lea.vmem %s1974_s1, 512  ;;  %p1637_p6 = scmp.lt.s32.totalorder %s1974_s1, %s1974_s1 }
  0xba   :  { %p1633_p5 = scmp.ne.s32.totalorder %s1974_s1, %s1632_s20  ;;  %p1638_p7 = scmp.lt.s32.totalorder %s1632_s20, %s1632_s20 }
  0xbc   :  { %p1639_p8 = por %p1638_p7, %p1637_p6 }
  0xbe   :  { %p1640_p9 = pnand %p1639_p8, %p1633_p5 }
  0xc0   :  { %1643 = shalt.err (!%p1640_p9)
}
  0xc1   :  { %148 = dma.hbm_to_vmem [thread:$0]  %s2290_s12, 512, %s1974_s1, [#allocation18], %s1751_s23, %s1751_s23, %s1752_s24  }
  0xc2   :  { %1732 = dma.done.wait [#allocation3], 64  }
  0xc3   :  { %1733 = vsyncadd [#allocation3], 4294967232 }
  0xc4   :  { %1734 = dma.done.wait [#allocation6], 1536  }
  0xc5   :  { %1735 = vsyncadd [#allocation6], 4294965760 }
  0xc6   :  { %1736 = dma.done.wait [#allocation9], 128  }
  0xc7   :  { %1737 = vsyncadd [#allocation9], 4294967168 }
  0xc8   :  { %1738 = dma.done.wait [#allocation12], 528  }
  0xc9   :  { %1739 = vsyncadd [#allocation12], 4294966768 }
  0xca   :  { %1740 = dma.done.wait [#allocation15], 528  }
  0xcb   :  { %1741 = vsyncadd [#allocation15], 4294966768 }
  0xcc   :  { %1742 = dma.done.wait [#allocation18], 512  }
  0xcd   :  { %1743 = vsyncadd [#allocation18], 4294966784  ;;  %v1764_v0 = vmov 0.0|0.0   ;;  %vm1765_vm0 = vmmov 0   ;;  %v1766_v1 = vmov 0.0   ;;  %v292_v2 = vlaneseq  ;;  %v194_v6 = vld [vmem:[#allocation11] sm:$0xff] }
  0xce   :  { %1333 = vmatprep.subr.bf16.mxu0 %v1764_v0  ;;  %1297 = vmatprep.mubr.msk.f32.mxu0 %vm1765_vm0, %v1766_v1  ;;  %v195_v7 = vld [vmem:[#allocation11 + $0x8] sm:$0xff]  ;;  %v196_v8 = vld [vmem:[#allocation11 + $0x10] sm:$0xff]  ;;  %v197_v10 = vld [vmem:[#allocation11 + $0x18] sm:$0xff]  ;;  %vm198_vm1 = vcmask 261120   ;;  %v1767_v25 = vmov 1966171168  }
  0xcf   :  { %1339 = vmatprep.subr.bf16.mxu1 %v1764_v0  ;;  %1308 = vmatprep.mubr.msk.f32.mxu1 %vm1765_vm0, %v1766_v1  ;;  %v2018_v3 = vshrl.u32 %v292_v2, 7  ;;  %v1334_v9 = vpack.c.bf16 %v195_v7, %v194_v6  ;;  %v2026_v11 = vld [vmem:[#allocation8] sm:$0xf]  ;;  %v1337_v14 = vpack.c.bf16 %v197_v10, %v196_v8  ;;  %v2036_v16 = vld [vmem:[#allocation2] sm:$0xf]  ;;  %v290_v26 = vunpack.c.l.s4 %v1767_v25  ;;  %v1266_v37 = vld [vmem:[#allocation7 + $0x8] sm:$0xff]  }
  0xd0   :  { %v2050_v20 = vld [vmem:[#allocation10] sm:$0xf]  ;;  %v1241_v34 = vld [vmem:[%s2285_s7] ss:$0 sm:$0xff]  ;;  %v1267_v38 = vld [vmem:[#allocation7 + $0x10] sm:$0xff]   ;;  %v1256_v47 = vunpack.c.l.bf16 %v1266_v37  ;;  %v1257_v48 = vunpack.c.h.bf16 %v1266_v37  ;;  %vm575_vm2 = vcmask 130112  }
  0xd1   :  { %v2021_v4 = vsub.s32 1, %v2018_v3  ;;  %v2024_v5 = vsub.s32 0, %v2018_v3  ;;  %1335 = vmatpush3.bf16.msra.mxu0 %v1334_v9  ;;  %v2034_v15 = vsub.s32 2, %v2018_v3  ;;  %v2041_v18 = vsub.s32 3, %v2018_v3  ;;  %v1251_v33 = vld [vmem:[#allocation7] sm:$0xff]   ;;  %v1268_v45 = vld [vmem:[#allocation7 + $0x18] sm:$0xff]  }
  0xd2   :  { %1336 = vmatprep.subr.bf16.mxu0 %v1764_v0  ;;  %v291_v28 = vunpack.c.0.s8 %v290_v26  ;;  %v1252_v40 = vunpack.c.l.bf16 %v1251_v33  ;;  %v1253_v43 = vunpack.c.h.bf16 %v1251_v33  ;;  %v1261_v49 = vunpack.c.h.bf16 %v1267_v38  ;;  %v1242_v63 = vld [vmem:[#allocation13] ss:$0 sm:$0xff]  ;;  %s1772_s4 = smov [#allocation19]  }
  0xd3   :  { %v355_v12 = vrot.slane %v2026_v11, %v2021_v4  ;;  %v344_v13 = vrot.slane %v2026_v11, %v2024_v5  ;;  %v366_v17 = vrot.slane %v2026_v11, %v2034_v15  ;;  %v377_v19 = vrot.slane %v2026_v11, %v2041_v18  ;;  %s1185_s5 = sshll.u32 %s1772_s4, 4  ;;  %s1186_s5 = int_to_ptr.vmem [resolvable:$true] %s1185_s5 }
  0xd4   :  { %v475_v21 = vrot.slane %v2050_v20, %v2024_v5  ;;  %v486_v22 = vrot.slane %v2050_v20, %v2021_v4  ;;  %v497_v23 = vrot.slane %v2050_v20, %v2034_v15  ;;  %v294_v30 = vsub.s32 %v291_v28, %v2018_v3 }
  0xd5   :  { %357 = vbcast.lane.b32.xlu1 %v355_v12, 256  ;;  %346 = vbcast.lane.b32.xlu0 %v344_v13, 256  ;;  %v1260_v56 = vunpack.c.l.bf16 %v1267_v38  ;;  %v1265_v57 = vunpack.c.h.bf16 %v1268_v45  ;;  %v1264_v9 = vunpack.c.l.bf16 %v1268_v45  ;;  %vm604_vm3 = vcmask 1041409  }
  0xd6   :  { %1338 = vmatpush3.bf16.msra.mxu0 %v1337_v14  ;;  %vm606_vm4 = vcmask 1042434   ;;  %vm608_vm5 = vcmask 1043459   ;;  %vm611_vm6 = vcmask 125952   ;;  %vm1175_vm7 = vcmask 257024  }
  0xd7   :  { %1345 = vmatprep.subr.bf16.mxu0 %v1764_v0 }
  0xd9   :  { %361 = vbcast.lane.b32.xlu1 %v355_v12, 264  ;;  %350 = vbcast.lane.b32.xlu0 %v344_v13, 264 }
  0xda   :  { %1298 = vmatmul.mubr.msk.f32.vlgmr.msra.gmra.mrb[0].mxu0 %vm198_vm1, %v2036_v16 }
  0xdb   :  { %1319 = vmatprep.mubr.msk.f32.mxu0 %vm1765_vm0, %v1766_v1 }
  0xdd   :  { %372 = vbcast.lane.b32.xlu1 %v366_v17, 264  ;;  %368 = vbcast.lane.b32.xlu0 %v366_v17, 256 }
  0xe1   :  { %383 = vbcast.lane.b32.xlu1 %v377_v19, 264  ;;  %379 = vbcast.lane.b32.xlu0 %v377_v19, 256 }
  0xe5   :  { %477 = vbcast.lane.b32.xlu1 %v475_v21, 256  ;;  %481 = vbcast.lane.b32.xlu0 %v475_v21, 264 }
  0xe9   :  { %488 = vbcast.lane.b32.xlu1 %v486_v22, 256  ;;  %499 = vbcast.lane.b32.xlu0 %v497_v23, 256 }
  0xed   :  { %492 = vbcast.lane.b32.xlu1 %v486_v22, 264 }
  0xf1   :  { %503 = vbcast.lane.b32.xlu1 %v497_v23, 264 }
 0x147   :  { %v347_v24 = vpop.permute.xlu0 %346  ;;  %v358_v27 = vpop.permute.xlu1 %357 }
 0x148   :  { %v392_v46 = vmul.f32 %v1241_v34, %v347_v24  ;;  %v394_v54 = vmul.f32 %v1241_v34, %v358_v27 }
 0x14b   :  { %v351_v29 = vpop.permute.xlu0 %350  ;;  %v362_v31 = vpop.permute.xlu1 %361 }
 0x14c   :  { %v393_v53 = vmul.f32 %v1241_v34, %v351_v29  ;;  %v395_v55 = vmul.f32 %v1241_v34, %v362_v31 }
 0x14f   :  { %v369_v39 = vpop.permute.xlu0 %368  ;;  %v373_v44 = vpop.permute.xlu1 %372 }
 0x150   :  { %v397_v7 = vmul.f32 %v1241_v34, %v373_v44  ;;  %v396_v8 = vmul.f32 %v1241_v34, %v369_v39 }
 0x153   :  { %v380_v62 = vpop.permute.xlu0 %379  ;;  %v384_v17 = vpop.permute.xlu1 %383 }
 0x154   :  { %v398_v23 = vmul.f32 %v1241_v34, %v380_v62 }
 0x1ad   :  { %v268_v32 = vpop.f32.mrb[0].mxu0 }
 0x1ae   :  { %v295_v35 = vrot.slane %v268_v32, %v294_v30  ;;  %v1299_v36 = vpop.f32.mrb[1].mxu0 }
 0x1b0   :  { %v296_v41 = vcombine.high %v295_v35, %v295_v35  ;;  %v303_v42 = vrot.slane %v295_v35, %v294_v30 }
 0x1b2   :  { %v310_v50 = vrot.slane %v296_v41, %v294_v30  ;;  %v311_v51 = vcombine.high %v303_v42, %v303_v42  ;;  %v316_v52 = vrot.slane %v303_v42, %v2024_v5  ;;  %v399_v30 = vmul.f32 %v1241_v34, %v384_v17  ;;  %v1243_v42 = vld [vmem:[#allocation14] ss:$0 sm:$0xff] }
 0x1b4   :  { %v312_v58 = vcombine.high %v310_v50, %v310_v50  ;;  %v333_v59 = vadd.f32 %v1252_v40, %v316_v52  ;;  %v320_v60 = vrot.slane %v310_v50, %v2024_v5  ;;  %v334_v61 = vadd.f32 %v1253_v43, %v316_v52 }
 0x1b5   :  { %v324_v6 = vrot.slane %v311_v51, %v2024_v5 }
 0x1b6   :  { %v400_v10 = vadd.f32 %v392_v46, %v333_v59  ;;  %v335_v12 = vadd.f32 %v1256_v47, %v320_v60  ;;  %v336_v13 = vadd.f32 %v1257_v48, %v320_v60  ;;  %v401_v14 = vadd.f32 %v393_v53, %v334_v61 }
 0x1b7   :  { %v338_v19 = vadd.f32 %v1261_v49, %v324_v6  ;;  %v337_v21 = vadd.f32 %v1260_v56, %v324_v6  ;;  %v328_v22 = vrot.slane %v312_v58, %v2024_v5 }
 0x1b8   :  { %v415_v24 = vadd.f32 %v1242_v63, %v400_v10  ;;  %v402_v25 = vadd.f32 %v394_v54, %v335_v12  ;;  %v403_v26 = vadd.f32 %v395_v55, %v336_v13  ;;  %v416_v27 = vadd.f32 %v1242_v63, %v401_v14  ;;  %v478_v10 = vpop.permute.xlu1 %477  ;;  %v482_v13 = vpop.permute.xlu0 %481 }
 0x1b9   :  { %v405_v28 = vadd.f32 %v397_v7, %v338_v19  ;;  %v404_v29 = vadd.f32 %v396_v8, %v337_v21  ;;  %v339_v31 = vadd.f32 %v1264_v9, %v328_v22  ;;  %v340_v35 = vadd.f32 %v1265_v57, %v328_v22 }
 0x1ba   :  { %1384 = vtanh.f32 %v415_v24  ;;  %v417_v32 = vadd.f32 %v1242_v63, %v402_v25  ;;  %v418_v33 = vadd.f32 %v1242_v63, %v403_v26  ;;  %v1768_v8 = vmov 0  }
 0x1bb   :  { %1386 = vtanh.f32 %v416_v27  ;;  %v419_v36 = vadd.f32 %v1242_v63, %v404_v29  ;;  %v406_v37 = vadd.f32 %v398_v23, %v339_v31  ;;  %v420_v38 = vadd.f32 %v1242_v63, %v405_v28  ;;  %1383 = vset.pattern.permute.xlu1 %v1768_v8  ;;  %1382 = vset.pattern.permute.xlu0 %v1768_v8 }
 0x1bc   :  { %1388 = vtanh.f32 %v417_v32  ;;  %v407_v39 = vadd.f32 %v399_v30, %v340_v35  ;;  %v508_v9 = vrot.slane %v2050_v20, %v2041_v18  ;;  %v489_v12 = vpop.permute.xlu1 %488  ;;  %v500_v17 = vpop.permute.xlu0 %499 }
 0x1bd   :  { %1390 = vtanh.f32 %v418_v33  ;;  %v421_v40 = vadd.f32 %v1242_v63, %v406_v37 }
 0x1be   :  { %1392 = vtanh.f32 %v419_v36  ;;  %v422_v41 = vadd.f32 %v1242_v63, %v407_v39 }
 0x1bf   :  { %1394 = vtanh.f32 %v421_v40 }
 0x1c0   :  { %1396 = vtanh.f32 %v420_v38  ;;  %v493_v14 = vpop.permute.xlu1 %492 }
 0x1c1   :  { %1398 = vtanh.f32 %v422_v41  ;;  %v565_v41 = vand.u32 127, %v292_v2 }
 0x1c4   :  { %v1385_v43 = vpop.eup %1384  ;;  %v504_v19 = vpop.permute.xlu1 %503 }
 0x1c5   :  { %v1387_v34 = vpop.eup %1386  ;;  %v438_v44 = vmul.f32 %v1385_v43, %v1243_v42  ;;  %v570_v43 = vadd.s32 4294967288, %v565_v41 }
 0x1c6   :  { %v1389_v45 = vpop.eup %1388  ;;  %v439_v46 = vmul.f32 %v1387_v34, %v1243_v42 }
 0x1c7   :  { %v446_v47 = vsel %vm198_vm1, %v438_v44, 0.0  ;;  %v440_v48 = vmul.f32 %v1389_v45, %v1243_v42  ;;  %v1391_v49 = vpop.eup %1390  ;;  %v2102_v45 = vsub.s32 %v565_v41, %v2018_v3 }
 0x1c8   :  { %v449_v50 = vsel %vm198_vm1, %v439_v46, 0.0  ;;  %447 = vadd.xlane.f32.xlu0 %v446_v47  ;;  %v1393_v51 = vpop.eup %1392  ;;  %v441_v55 = vmul.f32 %v1391_v49, %v1243_v42  ;;  %v2105_v46 = vsub.s32 %v570_v43, %v2018_v3 }
 0x1c9   :  { %450 = vadd.xlane.f32.xlu1 %v449_v50  ;;  %v442_v52 = vmul.f32 %v1393_v51, %v1243_v42  ;;  %v1395_v53 = vpop.eup %1394  ;;  %v452_v54 = vsel %vm198_vm1, %v440_v48, 0.0 }
 0x1ca   :  { %v1397_v56 = vpop.eup %1396  ;;  %v444_v58 = vmul.f32 %v1395_v53, %v1243_v42  ;;  %v455_v59 = vsel %vm198_vm1, %v441_v55, 0.0 }
 0x1cb   :  { %v458_v57 = vsel %vm198_vm1, %v442_v52, 0.0  ;;  %v443_v60 = vmul.f32 %v1397_v56, %v1243_v42  ;;  %v1399_v61 = vpop.eup %1398 }
 0x1cc   :  { %453 = vadd.xlane.f32.xlu0 %v452_v54  ;;  %v464_v62 = vsel %vm198_vm1, %v444_v58, 0.0  ;;  %v445_v6 = vmul.f32 %v1399_v61, %v1243_v42 }
 0x1cd   :  { %459 = vadd.xlane.f32.xlu1 %v458_v57  ;;  %v461_v63 = vsel %vm198_vm1, %v443_v60, 0.0 }
 0x1ce   :  { %v467_v7 = vsel %vm198_vm1, %v445_v6, 0.0 }
 0x1d0   :  { %456 = vadd.xlane.f32.xlu0 %v455_v59 }
 0x1d1   :  { %465 = vadd.xlane.f32.xlu1 %v464_v62 }
 0x1d4   :  { %462 = vadd.xlane.f32.xlu0 %v461_v63 }
 0x1d8   :  { %468 = vadd.xlane.f32.xlu0 %v467_v7 }
 0x1e2   :  { %514 = vbcast.lane.b32.xlu1 %v508_v9, 264 }
 0x1ee   :  { %510 = vbcast.lane.b32.xlu0 %v508_v9, 256 }
 0x255   :  { %v448_v21 = vpop.xlane.xlu0 %447 }
 0x256   :  { %v451_v22 = vpop.xlane.xlu1 %450  ;;  %v2076_v23 = vadd.f32 %v478_v10, %v448_v21 }
 0x257   :  { %v2078_v24 = vadd.f32 %v482_v13, %v451_v22 }
 0x258   :  { %541 = vperm.xlu0 %1382, %v2076_v23  }
 0x259   :  { %544 = vperm.xlu1 %1383, %v2078_v24   ;;  %v454_v25 = vpop.xlane.xlu0 %453 }
 0x25a   :  { %v460_v20 = vpop.xlane.xlu1 %459  ;;  %v2082_v26 = vadd.f32 %v489_v12, %v454_v25 }
 0x25b   :  { %v2087_v29 = vadd.f32 %v500_v17, %v460_v20 }
 0x25d   :  { %547 = vperm.xlu1 %1383, %v2082_v26   ;;  %v457_v27 = vpop.xlane.xlu0 %456 }
 0x25e   :  { %v2085_v28 = vadd.f32 %v493_v14, %v457_v27  ;;  %v466_v30 = vpop.xlane.xlu1 %465 }
 0x260   :  { %550 = vperm.xlu0 %1382, %v2085_v28  }
 0x261   :  { %553 = vperm.xlu1 %1383, %v2087_v29   ;;  %v463_v31 = vpop.xlane.xlu0 %462 }
 0x262   :  { %v2091_v32 = vadd.f32 %v504_v19, %v463_v31  ;;  %v515_v33 = vpop.permute.xlu1 %514 }
 0x264   :  { %556 = vperm.xlu0 %1382, %v2091_v32  }
 0x265   :  { %v469_v35 = vpop.xlane.xlu0 %468 }
 0x266   :  { %v2094_v36 = vadd.f32 %v515_v33, %v469_v35 }
 0x268   :  { %562 = vperm.xlu0 %1382, %v2094_v36  }
 0x269   :  { %v511_v37 = vpop.permute.xlu0 %510 }
 0x26a   :  { %v2097_v38 = vadd.f32 %v511_v37, %v466_v30 }
 0x26c   :  { %559 = vperm.xlu1 %1383, %v2097_v38  }
 0x2d7   :  { %v542_v40 = vpop.permute.xlu0 %541 }
 0x2d8   :  { %v545_v39 = vpop.permute.xlu1 %544  ;;  %v569_v50 = vrot.slane %v542_v40, %v2102_v45 }
 0x2d9   :  { %v574_v51 = vrot.slane %v545_v39, %v2105_v46 }
 0x2db   :  { %v576_v56 = vsel %vm575_vm2, %v574_v51, %v569_v50 }
 0x2dc   :  { %v548_v34 = vpop.permute.xlu1 %547 }
 0x2dd   :  { %v580_v2 = vrot.slane %v548_v34, %v2102_v45 }
 0x2df   :  { %v551_v42 = vpop.permute.xlu0 %550 }
 0x2e0   :  { %v584_v47 = vrot.slane %v551_v42, %v2105_v46  ;;  %v554_v48 = vpop.permute.xlu1 %553 }
 0x2e1   :  { %v589_v52 = vrot.slane %v554_v48, %v2102_v45 }
 0x2e2   :  { %v585_v54 = vsel %vm575_vm2, %v584_v47, %v580_v2 }
 0x2e3   :  { %v557_v44 = vpop.permute.xlu0 %556  ;;  %v605_v59 = vsel %vm604_vm3, %v585_v54, %v576_v56 }
 0x2e4   :  { %v593_v49 = vrot.slane %v557_v44, %v2105_v46 }
 0x2e6   :  { %v594_v3 = vsel %vm575_vm2, %v593_v49, %v589_v52 }
 0x2e7   :  { %v563_v53 = vpop.permute.xlu0 %562  ;;  %v607_v61 = vsel %vm606_vm4, %v594_v3, %v605_v59 }
 0x2e8   :  { %v602_v57 = vrot.slane %v563_v53, %v2105_v46 }
 0x2eb   :  { %v560_v55 = vpop.permute.xlu1 %559 }
 0x2ec   :  { %v598_v58 = vrot.slane %v560_v55, %v2102_v45 }
 0x2ee   :  { %v603_v60 = vsel %vm575_vm2, %v602_v57, %v598_v58 }
 0x2ef   :  { %v609_v62 = vsel %vm608_vm5, %v603_v60, %v607_v61 }
 0x2f0   :  { %v612_v63 = vsel %vm611_vm6, %v609_v62, -inf }
 0x2f1   :  { %613 = vmax.xlane.f32.xlu1 %v612_v63 }
 0x37e   :  { %v614_v6 = vpop.xlane.xlu1 %613 }
 0x37f   :  { %v619_v7 = vrot.slane %v614_v6, %v2024_v5  ;;  %v623_v8 = vrot.slane %v614_v6, %v2021_v4  ;;  %v627_v17 = vrot.slane %v614_v6, %v2034_v15 }
 0x381   :  { %v636_v9 = vsub.f32 %v2076_v23, %v619_v7  ;;  %v637_v10 = vsub.f32 %v2078_v24, %v619_v7  ;;  %v638_v13 = vsub.f32 %v2082_v26, %v623_v8  ;;  %v639_v19 = vsub.f32 %v2085_v28, %v623_v8 }
 0x382   :  { %v640_v22 = vsub.f32 %v2087_v29, %v627_v17  ;;  %v631_v23 = vrot.slane %v614_v6, %v2041_v18  ;;  %v641_v24 = vsub.f32 %v2091_v32, %v627_v17 }
 0x383   :  { %v644_v12 = vmul.f32 1.442695, %v636_v9  ;;  %v646_v14 = vmul.f32 1.442695, %v637_v10  ;;  %v648_v21 = vmul.f32 1.442695, %v638_v13 }
 0x384   :  { %v650_v25 = vmul.f32 1.442695, %v639_v19  ;;  %v652_v26 = vmul.f32 1.442695, %v640_v22  ;;  %v642_v30 = vsub.f32 %v2097_v38, %v631_v23  ;;  %v654_v28 = vmul.f32 1.442695, %v641_v24 }
 0x385   :  { %1400 = vpow2.f32 %v644_v12  ;;  %v643_v29 = vsub.f32 %v2094_v36, %v631_v23  ;;  %v893_v23 = vld [vmem:[%s2288_s10] sm:$0xff]  ;;  %v894_v24 = vld [vmem:[%s2288_s10 + $0x8] sm:$0xff] }
 0x386   :  { %1402 = vpow2.f32 %v646_v14  ;;  %v656_v33 = vmul.f32 1.442695, %v642_v30  ;;  %v1346_v30 = vpack.c.bf16 %v894_v24, %v893_v23 }
 0x387   :  { %1404 = vpow2.f32 %v648_v21  ;;  %v658_v37 = vmul.f32 1.442695, %v643_v29 }
 0x388   :  { %1406 = vpow2.f32 %v650_v25  ;;  %1347 = vmatpush3.bf16.msra.mxu0 %v1346_v30 }
 0x389   :  { %1408 = vpow2.f32 %v652_v26  ;;  %v899_v26 = vld [vmem:[#allocation16 + $0x10] sm:$0xff]  ;;  %1348 = vmatprep.subr.bf16.mxu0 %v1764_v0 }
 0x38a   :  { %1410 = vpow2.f32 %v654_v28  ;;  %v896_v28 = vld [vmem:[%s2288_s10 + $0x18] sm:$0xff] }
 0x38b   :  { %1412 = vpow2.f32 %v656_v33  ;;  %v2175_v33 = vld [vmem:[%s2281_s3] sm:$0xf] }
 0x38c   :  { %1414 = vpow2.f32 %v658_v37  ;;  %v187_v37 = vld [vmem:[#allocation5 + $0x8] sm:$0xff] }
 0x38f   :  { %v1401_v20 = vpop.eup %1400 }
 0x390   :  { %669 = vperm.xlu0 %1382, %v1401_v20   ;;  %v1403_v27 = vpop.eup %1402 }
 0x391   :  { %v1405_v31 = vpop.eup %1404 }
 0x392   :  { %v1407_v35 = vpop.eup %1406 }
 0x393   :  { %v1409_v39 = vpop.eup %1408 }
 0x394   :  { %672 = vperm.xlu0 %1382, %v1403_v27   ;;  %v1411_v32 = vpop.eup %1410 }
 0x395   :  { %v1413_v40 = vpop.eup %1412 }
 0x396   :  { %v1415_v38 = vpop.eup %1414 }
 0x398   :  { %675 = vperm.xlu0 %1382, %v1405_v31  }
 0x39c   :  { %678 = vperm.xlu0 %1382, %v1407_v35  }
 0x3a0   :  { %681 = vperm.xlu0 %1382, %v1409_v39  }
 0x3a4   :  { %684 = vperm.xlu0 %1382, %v1411_v32  }
 0x3a8   :  { %687 = vperm.xlu0 %1382, %v1413_v40  }
 0x3ac   :  { %690 = vperm.xlu0 %1382, %v1415_v38  }
 0x40f   :  { %v670_v41 = vpop.permute.xlu0 %669 }
 0x410   :  { %v695_v52 = vrot.slane %v670_v41, %v2102_v45 }
 0x413   :  { %v673_v42 = vpop.permute.xlu0 %672 }
 0x414   :  { %v699_v50 = vrot.slane %v673_v42, %v2105_v46 }
 0x416   :  { %v700_v55 = vsel %vm575_vm2, %v699_v50, %v695_v52 }
 0x417   :  { %v676_v43 = vpop.permute.xlu0 %675 }
 0x418   :  { %v704_v51 = vrot.slane %v676_v43, %v2102_v45  ;;  %v189_v43 = vld [vmem:[#allocation5 + $0x18] sm:$0xff] }
 0x41b   :  { %v679_v34 = vpop.permute.xlu0 %678 }
 0x41c   :  { %v708_v47 = vrot.slane %v679_v34, %v2105_v46 }
 0x41e   :  { %v709_v53 = vsel %vm575_vm2, %v708_v47, %v704_v51  ;;  %v190_v51 = vld [vmem:[#allocation5 + $0x20] sm:$0xff] }
 0x41f   :  { %v682_v36 = vpop.permute.xlu0 %681  ;;  %v728_v58 = vsel %vm604_vm3, %v709_v53, %v700_v55 }
 0x420   :  { %v713_v2 = vrot.slane %v682_v36, %v2102_v45  ;;  %v191_v36 = vld [vmem:[#allocation5 + $0x28] sm:$0xff] }
 0x423   :  { %v685_v44 = vpop.permute.xlu0 %684 }
 0x424   :  { %v717_v48 = vrot.slane %v685_v44, %v2105_v46 }
 0x426   :  { %v718_v54 = vsel %vm575_vm2, %v717_v48, %v713_v2 }
 0x427   :  { %v688_v49 = vpop.permute.xlu0 %687  ;;  %v729_v60 = vsel %vm606_vm4, %v718_v54, %v728_v58 }
 0x428   :  { %v722_v56 = vrot.slane %v688_v49, %v2102_v45 }
 0x42b   :  { %v691_v3 = vpop.permute.xlu0 %690 }
 0x42c   :  { %v726_v57 = vrot.slane %v691_v3, %v2105_v46 }
 0x42e   :  { %v727_v59 = vsel %vm575_vm2, %v726_v57, %v722_v56 }
 0x42f   :  { %v730_v61 = vsel %vm608_vm5, %v727_v59, %v729_v60 }
 0x430   :  { %v732_v62 = vsel %vm611_vm6, %v730_v61, 0.0 }
 0x431   :  { %733 = vadd.xlane.f32.xlu0 %v732_v62 }
 0x4be   :  { %v734_v63 = vpop.xlane.xlu0 %733 }
 0x4bf   :  { %v735_v6 = vmax.f32 %v734_v63, 1e-30 }
 0x4c1   :  { %1416 = vrcp.f32 %v735_v6  ;;  %v192_v6 = vld [vmem:[#allocation5 + $0x30] sm:$0xff] }
 0x4cb   :  { %v1417_v7 = vpop.eup %1416 }
 0x4cc   :  { %v749_v8 = vrot.slane %v1417_v7, %v2034_v15  ;;  %v741_v9 = vrot.slane %v1417_v7, %v2024_v5  ;;  %v745_v14 = vrot.slane %v1417_v7, %v2021_v4  ;;  %v753_v22 = vrot.slane %v1417_v7, %v2041_v18  ;;  %v897_v5 = vld [vmem:[#allocation16] sm:$0xff] }
 0x4cd   :  { %v895_v18 = vld [vmem:[%s2288_s10 + $0x10] sm:$0xff]  ;;  %s1769_s10 = smov 32  }
 0x4ce   :  { %v763_v10 = vmul.f32 %v1411_v32, %v749_v8  ;;  %v758_v12 = vmul.f32 %v1401_v20, %v741_v9  ;;  %v759_v13 = vmul.f32 %v1403_v27, %v741_v9  ;;  %v760_v17 = vmul.f32 %v1405_v31, %v745_v14  ;;  %v898_v20 = vld [vmem:[#allocation16 + $0x8] sm:$0xff]  ;;  %v900_v27 = vld [vmem:[#allocation16 + $0x18] sm:$0xff] }
 0x4cf   :  { %v761_v19 = vmul.f32 %v1407_v35, %v745_v14  ;;  %v762_v21 = vmul.f32 %v1409_v39, %v749_v8  ;;  %v764_v25 = vmul.f32 %v1413_v40, %v753_v22  ;;  %v765_v15 = vmul.f32 %v1415_v38, %v753_v22  ;;  %v186_v32 = vld [vmem:[#allocation5] sm:$0xff]  ;;  %v188_v38 = vld [vmem:[#allocation5 + $0x10] sm:$0xff]  ;;  %v193_v14 = vld [vmem:[#allocation5 + $0x38] sm:$0xff] }
 0x4d0   :  { %790 = vperm.xlu0 %1382, %v763_v10   ;;  %775 = vperm.xlu1 %1383, %v758_v12   ;;  %v1340_v4 = vpack.c.bf16 %v898_v20, %v897_v5  ;;  %v1343_v31 = vpack.c.bf16 %v900_v27, %v899_v26  ;;  %v1349_v29 = vpack.c.bf16 %v896_v28, %v895_v18 }
 0x4d2   :  { %1341 = vmatpush3.bf16.msra.mxu1 %v1340_v4  ;;  %1350 = vmatpush3.bf16.msra.mxu0 %v1349_v29 }
 0x4d3   :  { %1342 = vmatprep.subr.bf16.mxu1 %v1764_v0 }
 0x4d4   :  { %778 = vperm.xlu1 %1383, %v759_v13   ;;  %1166 = vrot.lane.b32.xlu0 %v2175_v33, %s1769_s10 }
 0x4d5   :  { %1320 = vmatmul.mubr.msk.f32.vlgmr.msra.gmra.mrb[2].mxu0 %vm198_vm1, %v2036_v16 }
 0x4d6   :  { %1344 = vmatpush3.bf16.msra.mxu1 %v1343_v31 }
 0x4d7   :  { %1351 = vmatprep.subr.bf16.mxu1 %v1764_v0 }
 0x4d8   :  { %781 = vperm.xlu1 %1383, %v760_v17  }
 0x4dc   :  { %784 = vperm.xlu1 %1383, %v761_v19  }
 0x4e0   :  { %787 = vperm.xlu1 %1383, %v762_v21  }
 0x4e4   :  { %793 = vperm.xlu1 %1383, %v764_v25  }
 0x4e8   :  { %796 = vperm.xlu1 %1383, %v765_v15  }
 0x54f   :  { %v776_v35 = vpop.permute.xlu1 %775  ;;  %v791_v44 = vpop.permute.xlu0 %790 }
 0x550   :  { %v849_v42 = vmul.f32 %v776_v35, %v186_v32  ;;  %v854_v2 = vmul.f32 %v791_v44, %v191_v36  ;;  %v823_v10 = vrot.slane %v791_v44, %v2105_v46  ;;  %v801_v17 = vrot.slane %v776_v35, %v2102_v45 }
 0x552   :  { %v857_v48 = vsel %vm198_vm1, %v849_v42, 0.0  ;;  %v876_v58 = vsel %vm198_vm1, %v854_v2, 0.0 }
 0x553   :  { %v779_v39 = vpop.permute.xlu1 %778 }
 0x554   :  { %v850_v40 = vmul.f32 %v779_v39, %v187_v37  ;;  %v805_v8 = vrot.slane %v779_v39, %v2105_v46 }
 0x556   :  { %v858_v34 = vsel %vm198_vm1, %v850_v40, 0.0  ;;  %v806_v20 = vsel %vm575_vm2, %v805_v8, %v801_v17 }
 0x557   :  { %v782_v41 = vpop.permute.xlu1 %781  ;;  %v859_v50 = vadd.f32 %v858_v34, %v857_v48  ;;  %v1059_v48 = vld [vmem:[#allocation17 + $0x8] sm:$0xff] }
 0x558   :  { %v851_v16 = vmul.f32 %v782_v41, %v188_v38  ;;  %v810_v9 = vrot.slane %v782_v41, %v2102_v45 }
 0x559   :  { %v860_v56 = vrot.slane %v859_v50, 4 }
 0x55a   :  { %v866_v52 = vsel %vm198_vm1, %v851_v16, 0.0 }
 0x55b   :  { %v785_v47 = vpop.permute.xlu1 %784  ;;  %v861_v12 = vadd.f32 %v860_v56, %v859_v50 }
 0x55c   :  { %v852_v49 = vmul.f32 %v785_v47, %v189_v43  ;;  %v814_v59 = vrot.slane %v785_v47, %v2105_v46  ;;  %v1058_v47 = vld [vmem:[#allocation17] sm:$0xff] }
 0x55d   :  { %v862_v26 = vrot.slane %v861_v12, 2  ;;  %v1352_v2 = vpack.c.bf16 %v1059_v48, %v1058_v47 }
 0x55e   :  { %v867_v53 = vsel %vm198_vm1, %v852_v49, 0.0  ;;  %v815_v19 = vsel %vm575_vm2, %v814_v59, %v810_v9 }
 0x55f   :  { %v868_v54 = vadd.f32 %v867_v53, %v866_v52  ;;  %v788_v3 = vpop.permute.xlu1 %787  ;;  %v834_v27 = vsel %vm604_vm3, %v815_v19, %v806_v20  ;;  %v863_v32 = vadd.f32 %v862_v26, %v861_v12  ;;  %v1060_v53 = vld [vmem:[#allocation17 + $0x10] sm:$0xff] }
 0x560   :  { %v853_v55 = vmul.f32 %v788_v3, %v190_v51  ;;  %v819_v62 = vrot.slane %v788_v3, %v2102_v45 }
 0x561   :  { %v869_v57 = vrot.slane %v868_v54, 4  ;;  %v864_v43 = vrot.slane %v863_v32, 1 }
 0x562   :  { %v875_v60 = vsel %vm198_vm1, %v853_v55, 0.0  ;;  %v824_v25 = vsel %vm575_vm2, %v823_v10, %v819_v62 }
 0x563   :  { %v870_v61 = vadd.f32 %v869_v57, %v868_v54  ;;  %v877_v63 = vadd.f32 %v876_v58, %v875_v60  ;;  %v794_v7 = vpop.permute.xlu1 %793  ;;  %v835_v18 = vsel %vm606_vm4, %v824_v25, %v834_v27  ;;  %v865_v49 = vadd.f32 %v864_v43, %v863_v32  ;;  %v1061_v54 = vld [vmem:[#allocation17 + $0x18] sm:$0xff] }
 0x564   :  { %v855_v21 = vmul.f32 %v794_v7, %v192_v6  ;;  %v828_v23 = vrot.slane %v794_v7, %v2102_v45  ;;  %v1355_v55 = vpack.c.bf16 %v1061_v54, %v1060_v53 }
 0x565   :  { %v878_v13 = vrot.slane %v877_v63, 4  ;;  %v871_v22 = vrot.slane %v870_v61, 2 }
 0x566   :  { %v884_v28 = vsel %vm198_vm1, %v855_v21, 0.0 }
 0x567   :  { %v879_v15 = vadd.f32 %v878_v13, %v877_v63  ;;  %v797_v5 = vpop.permute.xlu1 %796  ;;  %v872_v35 = vadd.f32 %v871_v22, %v870_v61  ;;  %v1247_v61 = vld [vmem:[%s2292_s14] ss:$0 sm:$0xff]  ;;  %s1770_s14 = smov 96  }
 0x568   :  { %v832_v4 = vrot.slane %v797_v5, %v2105_v46  ;;  %v856_v24 = vmul.f32 %v797_v5, %v193_v14 }
 0x569   :  { %v880_v30 = vrot.slane %v879_v15, 2  ;;  %v873_v38 = vrot.slane %v872_v35, 1 }
 0x56a   :  { %v833_v31 = vsel %vm575_vm2, %v832_v4, %v828_v23  ;;  %v885_v29 = vsel %vm198_vm1, %v856_v24, 0.0 }
 0x56b   :  { %v886_v37 = vadd.f32 %v885_v29, %v884_v28  ;;  %v836_v39 = vsel %vm608_vm5, %v833_v31, %v835_v18  ;;  %v881_v45 = vadd.f32 %v880_v30, %v879_v15  ;;  %v874_v16 = vadd.f32 %v873_v38, %v872_v35 }
 0x56c   :  { %v839_v46 = vadd.f32 %v836_v39, %v2026_v11  ;;  %838 = vst.msk [vmem:[#allocation19] sm:$0xf] %vm611_vm6, %v836_v39 }
 0x56d   :  { %v887_v40 = vrot.slane %v886_v37, 4  ;;  %v882_v42 = vrot.slane %v881_v45, 1  ;;  %v905_v11 = vsel %vm604_vm3, %v874_v16, %v865_v49 }
 0x56e   :  { %840 = vst.msk [vmem:[#allocation20] sm:$0xf] %vm611_vm6, %v839_v46 }
 0x56f   :  { %v888_v41 = vadd.f32 %v887_v40, %v886_v37  ;;  %v883_v44 = vadd.f32 %v882_v42, %v881_v45 }
 0x571   :  { %v889_v34 = vrot.slane %v888_v41, 2  ;;  %v906_v52 = vsel %vm606_vm4, %v883_v44, %v905_v11 }
 0x573   :  { %v890_v36 = vadd.f32 %v889_v34, %v888_v41 }
 0x575   :  { %v891_v50 = vrot.slane %v890_v36, 1 }
 0x577   :  { %v892_v51 = vadd.f32 %v891_v50, %v890_v36 }
 0x579   :  { %v907_v3 = vsel %vm608_vm5, %v892_v51, %v906_v52 }
 0x57a   :  { %1309 = vmatmul.mubr.msk.f32.vlgmr.msra.gmra.mrb[0].mxu1 %vm198_vm1, %v907_v3  ;;  %1178 = vst.msk [vmem:[#allocation23] sm:$0xf] %vm1175_vm7, %v907_v3 }
 0x57b   :  { %1353 = vmatpush3.bf16.msra.mxu1 %v1352_v2  ;;  %1330 = vmatprep.mubr.msk.f32.mxu1 %vm1765_vm0, %v1766_v1 }
 0x57c   :  { %1354 = vmatprep.subr.bf16.mxu1 %v1764_v0  ;;  %v1246_v0 = vld [vmem:[%s2291_s13] ss:$0 sm:$0xff]  ;;  %s1771_s13 = smov [#allocation20]  }
 0x57d   :  { %s1195_s21 = sshll.u32 %s1771_s13, 4  ;;  %s1196_s21 = int_to_ptr.vmem [resolvable:$true] %s1195_s21 }
 0x57e   :  { %s1644_s9 = scalar_lea.vmem %s1196_s21, 64  ;;  %p1649_p11 = scmp.lt.s32.totalorder %s1196_s21, %s1196_s21 }
 0x57f   :  { %1356 = vmatpush3.bf16.msra.mxu1 %v1355_v55  ;;  %p1645_p10 = scmp.ne.s32.totalorder %s1196_s21, %s1644_s9  ;;  %p1650_p12 = scmp.lt.s32.totalorder %s1644_s9, %s1644_s9 }
 0x581   :  { %p1651_p13 = por %p1650_p12, %p1649_p11 }
 0x582   :  { %1331 = vmatmul.mubr.msk.f32.vlgmr.msra.gmra.mrb[2].mxu1 %vm198_vm1, %v2175_v33 }
 0x583   :  { %p1652_p0 = pnand %p1651_p13, %p1645_p10 }
 0x5a8   :  { %v1046_v56 = vpop.f32.mrb[2].mxu0 }
 0x5a9   :  { %v1321_v57 = vpop.f32.mrb[3].mxu0 }
 0x64d   :  { %v976_v58 = vpop.f32.mrb[0].mxu1 }
 0x64e   :  { %v1047_v59 = vadd.f32 %v1046_v56, %v976_v58  ;;  %v1310_v60 = vpop.f32.mrb[1].mxu1 }
 0x650   :  { %v1057_v1 = vadd.f32 %v1246_v0, %v1047_v59 }
 0x655   :  { %v1138_v62 = vpop.f32.mrb[2].mxu1 }
 0x656   :  { %v1139_v63 = vadd.f32 %v1247_v61, %v1138_v62  ;;  %v1332_v6 = vpop.f32.mrb[3].mxu1 }
 0x658   :  { %1150 = vrot.lane.b32.xlu1 %v1139_v63, %s1758_s0  ;;  %v1142_v33 = vadd.f32 %v1139_v63, %v1057_v1 }
 0x65a   :  { %v1249_v7 = vmul.f32 -1.442695, %v1142_v33 }
 0x65c   :  { %1418 = vpow2.f32 %v1249_v7 }
 0x666   :  { %v1419_v8 = vpop.eup %1418 }
 0x667   :  { %v1146_v9 = vadd.f32 1.0, %v1419_v8 }
 0x669   :  { %1420 = vrcp.f32 %v1146_v9 }
 0x673   :  { %v2221_v10 = vpop.eup %1420 }
 0x6ca   :  { %v1151_v12 = vpop.permute.xlu1 %1150 }
 0x6cb   :  { %v1153_v13 = vmul.f32 %v2221_v10, %v1151_v12 }
 0x6cd   :  { %1155 = vrot.lane.b32.xlu1 %v1153_v13, %s1758_s0 }
 0x73f   :  { %v1156_v14 = vpop.permute.xlu1 %1155 }
 0x740   :  { %v1158_v17 = vadd.f32 %v1156_v14, %v1057_v1 }
 0x742   :  { %1422 = vtanh.f32 %v1158_v17 }
 0x74c   :  { %v1423_v19 = vpop.eup %1422 }
 0x74d   :  { %1162 = vrot.lane.b32.xlu1 %v1423_v19, %s1770_s14 }
 0x74e   :  { %1655 = shalt.err (!%p1652_p0)
}
 0x74f   :  { %s1656_s25 = scalar_lea.hbm %s2294_s16, 64 }
 0x750   :  { %p1657_p1 = scmp.ne.s32.totalorder %s2294_s16, %s1656_s25  ;;  %p1660_p2 = scmp.lt.u32.totalorder %s1656_s25, %s2294_s16 }
 0x752   :  { %p1662_p3 = pnand %p1660_p2, %p1657_p1 }
 0x754   :  { %1665 = shalt.err (!%p1662_p3)
}
 0x755   :  { %1198 = dma.vmem_to_hbm [thread:$0]  %s1196_s21, 64, %s2294_s16, [#allocation21]  }
 0x756   :  { %s1666_s24 = scalar_lea.vmem %s1186_s5, 64  ;;  %p1671_p5 = scmp.lt.s32.totalorder %s1186_s5, %s1186_s5 }
 0x757   :  { %p1667_p4 = scmp.ne.s32.totalorder %s1186_s5, %s1666_s24  ;;  %p1672_p6 = scmp.lt.s32.totalorder %s1666_s24, %s1666_s24 }
 0x759   :  { %p1673_p7 = por %p1672_p6, %p1671_p5 }
 0x75b   :  { %p1674_p8 = pnand %p1673_p7, %p1667_p4 }
 0x75d   :  { %1677 = shalt.err (!%p1674_p8)
}
 0x75e   :  { %s1678_s22 = scalar_lea.hbm %s2293_s15, 64 }
 0x75f   :  { %p1679_p9 = scmp.ne.s32.totalorder %s2293_s15, %s1678_s22  ;;  %p1682_p10 = scmp.lt.u32.totalorder %s1678_s22, %s2293_s15 }
 0x761   :  { %p1684_p11 = pnand %p1682_p10, %p1679_p9 }
 0x763   :  { %1687 = shalt.err (!%p1684_p11)
}
 0x764   :  { %1188 = dma.vmem_to_hbm [thread:$0]  %s1186_s5, 64, %s2293_s15, [#allocation4]   ;;  %v1167_v21 = vpop.permute.xlu0 %1166  ;;  %v1160_v22 = vsub.f32 1.0, %v2221_v10 }
 0x765   :  { %s1773_s10 = smov [#allocation23]  }
 0x766   :  { %s1215_s3 = sshll.u32 %s1773_s10, 4  ;;  %s1216_s3 = int_to_ptr.vmem [resolvable:$true] %s1215_s3 }
 0x767   :  { %s1688_s18 = scalar_lea.vmem %s1216_s3, 64  ;;  %p1693_p13 = scmp.lt.s32.totalorder %s1216_s3, %s1216_s3 }
 0x768   :  { %p1689_p12 = scmp.ne.s32.totalorder %s1216_s3, %s1688_s18  ;;  %p1694_p0 = scmp.lt.s32.totalorder %s1688_s18, %s1688_s18 }
 0x76a   :  { %p1695_p1 = por %p1694_p0, %p1693_p13 }
 0x76c   :  { %p1696_p2 = pnand %p1695_p1, %p1689_p12 }
 0x7bf   :  { %v1163_v25 = vpop.permute.xlu1 %1162 }
 0x7c0   :  { %1699 = shalt.err (!%p1696_p2)
}
 0x7c1   :  { %s2310_s13 = sld [smem:[#allocation38_spill]] }
 0x7c7   :  { %s1700_s21 = scalar_lea.hbm %s2310_s13, 64 }
 0x7c8   :  { %p1701_p3 = scmp.ne.s32.totalorder %s2310_s13, %s1700_s21  ;;  %p1704_p4 = scmp.lt.u32.totalorder %s1700_s21, %s2310_s13 }
 0x7ca   :  { %p1706_p5 = pnand %p1704_p4, %p1701_p3 }
 0x7cc   :  { %1709 = shalt.err (!%p1706_p5)
}
 0x7cd   :  { %1218 = dma.vmem_to_hbm [thread:$0]  %s1216_s3, 64, %s2310_s13, [#allocation24]   ;;  %v1169_v15 = vmul.f32 %v2221_v10, %v1167_v21  ;;  %v1165_v5 = vmul.f32 %v1163_v25, %v1160_v22 }
 0x7ce   :  { %s1774_s25 = smov [#allocation22]  }
 0x7cf   :  { %v1170_v20 = vadd.f32 %v1169_v15, %v1165_v5  ;;  %s1205_s20 = sshll.u32 %s1774_s25, 4  ;;  %s1206_s20 = int_to_ptr.vmem [resolvable:$true] %s1205_s20 }
 0x7d0   :  { %s1710_s11 = scalar_lea.vmem %s1206_s20, 64  ;;  %p1715_p7 = scmp.lt.s32.totalorder %s1206_s20, %s1206_s20 }
 0x7d1   :  { %1172 = vrot.lane.b32.xlu1 %v1170_v20, %s1770_s14  ;;  %p1711_p6 = scmp.ne.s32.totalorder %s1206_s20, %s1710_s11  ;;  %p1716_p8 = scmp.lt.s32.totalorder %s1710_s11, %s1710_s11 }
 0x7d3   :  { %p1717_p9 = por %p1716_p8, %p1715_p7 }
 0x7d5   :  { %p1718_p10 = pnand %p1717_p9, %p1711_p6 }
 0x843   :  { %v1173_v23 = vpop.permute.xlu1 %1172 }
 0x844   :  { %1176 = vst.msk [vmem:[#allocation22] sm:$0xf] %vm1175_vm7, %v1173_v23 }
 0x845   :  { %1721 = shalt.err (!%p1718_p10)
}
 0x846   :  { %s2311_s23 = sld [smem:[#allocation37_spill]] }
 0x84c   :  { %s1722_s7 = scalar_lea.hbm %s2311_s23, 64 }
 0x84d   :  { %p1723_p11 = scmp.ne.s32.totalorder %s2311_s23, %s1722_s7  ;;  %p1726_p12 = scmp.lt.u32.totalorder %s1722_s7, %s2311_s23 }
 0x84f   :  { %p1728_p13 = pnand %p1726_p12, %p1723_p11 }
 0x851   :  { %1731 = shalt.err (!%p1728_p13)
}
 0x852   :  { %1208 = dma.vmem_to_hbm [thread:$0]  %s1206_s20, 64, %s2311_s23, [#allocation21]  }
 0x853   :  { %1744 = dma.done.wait [#allocation4], 64  }
 0x854   :  { %1745 = vsyncadd [#allocation4], 4294967232 }
 0x855   :  { %1746 = dma.done.wait [#allocation21], 128  }
 0x856   :  { %1747 = vsyncadd [#allocation21], 4294967168 }
 0x857   :  { %1748 = dma.done.wait [#allocation24], 64  }
 0x858   :  { %1749 = vsyncadd [#allocation24], 4294967232 }
 0x859   :  { %1231 = vsyncpa [#allocation3], 1 }
 0x85a   :  { %1232 = vsyncpa [#allocation6], 1 }
 0x85b   :  { %1233 = vsyncpa [#allocation9], 1 }
 0x85c   :  { %1234 = vsyncpa [#allocation12], 1 }
 0x85d   :  { %1235 = vsyncpa [#allocation15], 1 }
 0x85e   :  { %1236 = vsyncpa [#allocation18], 1 }
 0x85f   :  { %1237 = vsyncpa [#allocation4], 1 }
 0x860   :  { %1238 = vsyncpa [#allocation21], 1 }
 0x861   :  { %1239 = vsyncpa [#allocation24], 1 }

</bundles_post_ra>
